<compile_context>
chip_gen: v5e
topology: v5e:2x2
jax: 0.10.0
libtpu: 0.0.40
codegen_flags: <defaults>
</compile_context>

<pallas_src>
import functools
import math

import jax
import jax.numpy as jnp
from jax.experimental import pallas as pl
from jax.experimental.pallas import tpu as pltpu

_GROUPS = 32
_ACT_DTYPE = jnp.bfloat16


def _derive_vmem_limit():
    # Our tiles only need a few MiB; keep well under the smallest physical VMEM (v7x: 64 MiB/TC).
    try:
        cap = pltpu.get_tpu_info().vmem_capacity_bytes
    except Exception:
        cap = 64 * 1024 * 1024
    return int(min(48 * 1024 * 1024, cap * 3 // 4))


_VMEM_LIMIT = _derive_vmem_limit()


def _pick_tile(dim, candidates):
    for c in candidates:
        if dim >= c and dim % c == 0:
            return c
    return dim  # fall back to the full dimension (always legal as a block size)


# ----------------------------------------------------------------------------- Pallas kernels

@functools.lru_cache(maxsize=None)
def _matmul_fn(M, K, N, relu, add_identity, out_dtype_name):
    """out[M,N] = maybe_relu( x[M,K] @ w[K,N] + shift[1,N] (+ identity[M,N]) )

    Tiled over (M, N, K); K is the innermost (arbitrary) reduction axis accumulated
    in an f32 VMEM scratch. BN scale is pre-folded into w, so the epilogue is add-only.
    """
    out_dtype = jnp.dtype(out_dtype_name)
    tm = _pick_tile(M, (512, 256, 128, 64, 32, 16, 8))
    tn = _pick_tile(N, (256, 128))
    tk = _pick_tile(K, (512, 256, 128))
    grid = (M // tm, N // tn, K // tk)

    def kernel(*refs):
        if add_identity:
            x_ref, w_ref, t_ref, id_ref, o_ref, acc_ref = refs
        else:
            x_ref, w_ref, t_ref, o_ref, acc_ref = refs
            id_ref = None

        @pl.when(pl.program_id(2) == 0)
        def _():
            acc_ref[...] = jnp.zeros_like(acc_ref)

        acc_ref[...] += jnp.dot(x_ref[...], w_ref[...],
                                preferred_element_type=jnp.float32)

        @pl.when(pl.program_id(2) == pl.num_programs(2) - 1)
        def _():
            r = acc_ref[...] + t_ref[...]
            if add_identity:
                r = r + id_ref[...].astype(jnp.float32)
            if relu:
                r = jnp.maximum(r, 0.0)
            o_ref[...] = r.astype(o_ref.dtype)

    in_specs = [
        pl.BlockSpec((tm, tk), lambda i, j, k: (i, k)),
        pl.BlockSpec((tk, tn), lambda i, j, k: (k, j)),
        pl.BlockSpec((1, tn), lambda i, j, k: (0, j)),
    ]
    if add_identity:
        in_specs.append(pl.BlockSpec((tm, tn), lambda i, j, k: (i, j)))

    f = pl.pallas_call(
        kernel,
        out_shape=jax.ShapeDtypeStruct((M, N), out_dtype),
        grid_spec=pltpu.PrefetchScalarGridSpec(
            num_scalar_prefetch=0,
            grid=grid,
            in_specs=in_specs,
            out_specs=pl.BlockSpec((tm, tn), lambda i, j, k: (i, j)),
            scratch_shapes=[pltpu.VMEM((tm, tn), jnp.float32)],
        ),
        compiler_params=pltpu.CompilerParams(
            dimension_semantics=("parallel", "parallel", "arbitrary"),
            vmem_limit_bytes=_VMEM_LIMIT,
        ),
    )
    return jax.jit(f)


@functools.lru_cache(maxsize=None)
def _maxpool9_fn(M, C, dtype_name):
    """MaxPool2d(3, stride=2, pad=1): elementwise max over the 9 window taps, tiled over rows."""
    dtype = jnp.dtype(dtype_name)
    tm = _pick_tile(M, (1024, 512, 256, 128, 64, 32, 16, 8))

    def kernel(*refs):
        o_ref = refs[-1]
        r = refs[0][...]
        for t in refs[1:9]:
            r = jnp.maximum(r, t[...])
        o_ref[...] = r

    f = pl.pallas_call(
        kernel,
        out_shape=jax.ShapeDtypeStruct((M, C), dtype),
        grid=(M // tm,),
        in_specs=[pl.BlockSpec((tm, C), lambda i: (i, 0))] * 9,
        out_specs=pl.BlockSpec((tm, C), lambda i: (i, 0)),
        compiler_params=pltpu.CompilerParams(
            dimension_semantics=("parallel",),
            vmem_limit_bytes=_VMEM_LIMIT,
        ),
    )
    return jax.jit(f)


@functools.lru_cache(maxsize=None)
def _avgpool_fn(N, HW, C, in_dtype_name, out_dtype_name):
    """AdaptiveAvgPool2d(1): mean over the flattened spatial axis, tiled over channels."""
    tc = _pick_tile(C, (512, 256, 128))

    def kernel(x_ref, o_ref):
        o_ref[...] = jnp.mean(x_ref[...].astype(jnp.float32), axis=1).astype(o_ref.dtype)

    f = pl.pallas_call(
        kernel,
        out_shape=jax.ShapeDtypeStruct((N, C), jnp.dtype(out_dtype_name)),
        grid=(C // tc,),
        in_specs=[pl.BlockSpec((N, HW, tc), lambda j: (0, 0, j))],
        out_specs=pl.BlockSpec((N, tc), lambda j: (0, j)),
        compiler_params=pltpu.CompilerParams(
            dimension_semantics=("parallel",),
            vmem_limit_bytes=_VMEM_LIMIT,
        ),
    )
    return jax.jit(f)


# ----------------------------------------------------------------------------- JAX glue

def _im2col(x, kh, kw, stride, pad):
    """x: (N,H,W,C) -> patches (N,Ho,Wo, kh*kw*C); last-dim order is (ky, kx, c)."""
    # TODO(synk): im2col materializes a kh*kw-times-larger activation in HBM; folding the tap
    #             accumulation into the matmul kernel's K axis would remove this traffic.
    N, H, W, C = x.shape
    if pad:
        x = jnp.pad(x, ((0, 0), (pad, pad), (pad, pad), (0, 0)), constant_values=0.0)
    Ho = (H + 2 * pad - kh) // stride + 1
    Wo = (W + 2 * pad - kw) // stride + 1
    cols = []
    for ky in range(kh):
        for kx in range(kw):
            cols.append(x[:, ky:ky + stride * (Ho - 1) + 1:stride,
                            kx:kx + stride * (Wo - 1) + 1:stride, :])
    return jnp.concatenate(cols, axis=-1), Ho, Wo


def conv_bn(x, layer, *, relu, identity=None, out_dtype=None):
    """Conv2d(bias=False) + BN(eval, scale pre-folded into w) + optional residual + optional ReLU.

    `layer` holds a pre-packed (K, Cout) bf16 weight and a (1, Cout) f32 shift.
    """
    N = x.shape[0]
    kh, kw, stride, pad = layer["kh"], layer["kw"], layer["stride"], layer["pad"]
    if kh == 1 and kw == 1 and pad == 0:
        xs = x[:, ::stride, ::stride, :]                      # im2col is a no-op for 1x1 convs
        Ho, Wo = xs.shape[1], xs.shape[2]
        a = xs.reshape(N * Ho * Wo, xs.shape[3])
    else:
        patches, Ho, Wo = _im2col(x, kh, kw, stride, pad)
        a = patches.reshape(N * Ho * Wo, patches.shape[-1])
    K, Cout = layer["w"].shape
    M = a.shape[0]
    out_dtype = jnp.dtype(out_dtype or _ACT_DTYPE)
    fn = _matmul_fn(M, K, Cout, bool(relu), identity is not None, out_dtype.name)
    args = (a, layer["w"], layer["shift"])
    if identity is not None:
        args = args + (identity.reshape(M, Cout),)
    out = fn(*args)
    return out.reshape(N, Ho, Wo, Cout)


def maxpool_3x3_s2(x):
    N, H, W, C = x.shape
    k, s, pad = 3, 2, 1
    Ho = (H + 2 * pad - k) // s + 1
    Wo = (W + 2 * pad - k) // s + 1
    xp = jnp.pad(x, ((0, 0), (pad, pad), (pad, pad), (0, 0)), constant_values=-jnp.inf)
    taps = []
    for ky in range(k):
        for kx in range(k):
            taps.append(xp[:, ky:ky + s * (Ho - 1) + 1:s,
                             kx:kx + s * (Wo - 1) + 1:s, :].reshape(N * Ho * Wo, C))
    out = _maxpool9_fn(N * Ho * Wo, C, x.dtype.name)(*taps)
    return out.reshape(N, Ho, Wo, C)


# ----------------------------------------------------------------------------- parameters

def _conv_w(key, cout, cin_g, kh, kw):
    fan_in = cin_g * kh * kw
    return (jax.random.normal(key, (cout, cin_g, kh, kw), jnp.float32)
            * math.sqrt(2.0 / fan_in)).astype(jnp.float32)


def _bn_fused(key, c, eps=1e-5):
    k1, k2, k3, k4 = jax.random.split(key, 4)
    gamma = 1.0 + 0.1 * jax.random.normal(k1, (c,), jnp.float32)
    beta = 0.05 * jax.random.normal(k2, (c,), jnp.float32)
    mean = 0.05 * jax.random.normal(k3, (c,), jnp.float32)
    var = 1.0 + 0.1 * jax.random.uniform(k4, (c,), jnp.float32)
    scale = gamma / jnp.sqrt(var + eps)
    shift = beta - mean * scale
    return scale.astype(jnp.float32), shift.astype(jnp.float32)


def _blockdiag_weight(w, groups):
    """Grouped conv weight (Cout, Cg, kh, kw) -> dense block-diagonal (kh*kw*Cin, Cout)."""
    Cout, Cg, kh, kw = w.shape
    Cin = Cg * groups
    Ng = Cout // groups
    w_t = jnp.transpose(w, (2, 3, 1, 0)).reshape(kh, kw, Cg, groups, Ng)   # (kh,kw,Cg,g_out,Ng)
    eye = jnp.eye(groups, dtype=w.dtype)
    # wd[h,w,f,c,g,n] = w_t[h,w,c,g,n] if f == g else 0   (f = input group, g = output group)
    wd = jnp.einsum("hwcgn,fg->hwfcgn", w_t, eye)
    return wd.reshape(kh * kw * Cin, Cout)


def _pack_conv(w_oihw, scale, shift, *, stride, pad, groups=1):
    """Pre-transpose to (K, Cout), fold BN scale into the weight, cast to bf16."""
    Cout, Cin_g, kh, kw = w_oihw.shape
    if groups == 1:
        w2 = jnp.transpose(w_oihw, (2, 3, 1, 0)).reshape(kh * kw * Cin_g, Cout)
    else:
        w2 = _blockdiag_weight(w_oihw, groups)
    w2 = (w2 * scale[None, :]).astype(_ACT_DTYPE)
    return {"w": w2, "shift": shift.reshape(1, Cout).astype(jnp.float32),
            "kh": kh, "kw": kw, "stride": stride, "pad": pad}


def make_resnext50_params(key, num_classes):
    keys = iter(jax.random.split(key, 256))
    nk = lambda: next(keys)
    params = {
        "conv1": _pack_conv(_conv_w(nk(), 64, 3, 7, 7), *_bn_fused(nk(), 64), stride=2, pad=3),
    }
    inplanes = 64
    layers_cfg = [(64, 3, 1), (128, 4, 2), (256, 6, 2), (512, 3, 2)]  # (planes, blocks, stride)
    layers = []
    for planes, nblocks, stride in layers_cfg:
        width = int(planes * (4 / 64.0)) * _GROUPS          # ResNeXt-50 32x4d width rule
        out_c = planes * 4
        blocks = []
        for b in range(nblocks):
            s = stride if b == 0 else 1
            blk = {
                "conv1": _pack_conv(_conv_w(nk(), width, inplanes, 1, 1),
                                    *_bn_fused(nk(), width), stride=1, pad=0),
                "conv2": _pack_conv(_conv_w(nk(), width, width // _GROUPS, 3, 3),
                                    *_bn_fused(nk(), width), stride=s, pad=1, groups=_GROUPS),
                "conv3": _pack_conv(_conv_w(nk(), out_c, width, 1, 1),
                                    *_bn_fused(nk(), out_c), stride=1, pad=0),
            }
            if b == 0 and (s != 1 or inplanes != out_c):
                blk["down"] = _pack_conv(_conv_w(nk(), out_c, inplanes, 1, 1),
                                         *_bn_fused(nk(), out_c), stride=s, pad=0)
            blocks.append(blk)
            inplanes = out_c
        layers.append(blocks)
    params["layers"] = layers
    # replaced head: Sequential(Dropout(0.5), Linear(2048, num_classes)); weight ~ N(0, 0.01), bias 0
    fc_w = 0.01 * jax.random.normal(nk(), (num_classes, 2048), jnp.float32)
    params["fc_w"] = jnp.transpose(fc_w).astype(_ACT_DTYPE)       # pre-transposed (2048, nc)
    params["fc_b"] = jnp.zeros((1, num_classes), jnp.float32)
    return params


# ----------------------------------------------------------------------------- forward

def bottleneck(x, blk):
    if "down" in blk:
        identity = conv_bn(x, blk["down"], relu=False)
    else:
        identity = x
    out = conv_bn(x, blk["conv1"], relu=True)
    out = conv_bn(out, blk["conv2"], relu=True)          # grouped 3x3 (block-diagonal dense weight)
    # conv3 + BN + residual add + ReLU fused in one matmul epilogue
    out = conv_bn(out, blk["conv3"], relu=True, identity=identity)
    return out


def resnext50_forward(params, x_nchw):
    # layout: NCHW in (PyTorch convention) -> NHWC (channels on lanes) internally, bf16 activations.
    x = jnp.transpose(x_nchw, (0, 2, 3, 1)).astype(_ACT_DTYPE)
    x = conv_bn(x, params["conv1"], relu=True)
    x = maxpool_3x3_s2(x)
    for blocks in params["layers"]:
        for blk in blocks:
            x = bottleneck(x, blk)
    N, H, W, C = x.shape
    pooled = _avgpool_fn(N, H * W, C, x.dtype.name, _ACT_DTYPE.__name__)(
        x.reshape(N, H * W, C))                                         # (N, 2048) bf16
    # TODO(synk): Dropout(p=0.5) is identity in eval mode; stochastic masking not implemented.
    nc = params["fc_w"].shape[1]
    logits = _matmul_fn(N, C, nc, False, False, "float32")(
        pooled, params["fc_w"], params["fc_b"])
    return logits


# ----------------------------------------------------------------------------- main

if __name__ == "__main__":
    num_classes = 10
    key = jax.random.PRNGKey(0)
    pkey, xkey = jax.random.split(key)
    params = make_resnext50_params(pkey, num_classes)
    x = jax.random.normal(xkey, (2, 3, 64, 64), jnp.float32)   # NCHW, like the PyTorch module
    out = resnext50_forward(params, x)
    out = jax.block_until_ready(out)
    assert out.shape == (2, num_classes)
    assert bool(jnp.all(jnp.isfinite(out)))
    print("KERNEL_OK")
</pallas_src>

<mosaic_0001>
module attributes {stable_mosaic.version = 11 : i64} {
  func.func @kernel(%arg0: i32, %arg1: i32, %arg2: i32, %arg3: memref<512x147xbf16, #tpu.memory_space<vmem>>, %arg4: memref<147x64xbf16, #tpu.memory_space<vmem>>, %arg5: memref<1x64xf32, #tpu.memory_space<vmem>>, %arg6: memref<512x64xbf16, #tpu.memory_space<vmem>>, %arg7: memref<512x64xf32, #tpu.memory_space<vmem>>) attributes {dimension_semantics = [#tpu.dimension_semantics<parallel>, #tpu.dimension_semantics<parallel>, #tpu.dimension_semantics<arbitrary>], iteration_bounds = array<i64: 4, 1, 1>, scalar_prefetch = 0 : i64, scratch_operands = 1 : i64, tpu.core_type = #tpu.core_type<tc>, window_params = [{transform_indices = @transform_0, window_bounds = array<i64: 512, 147>}, {transform_indices = @transform_1, window_bounds = array<i64: 147, 64>}, {transform_indices = @transform_2, window_bounds = array<i64: 1, 64>}, {transform_indices = @transform_3, window_bounds = array<i64: 512, 64>}]} {
    %c0_i32 = arith.constant 0 : i32
    %0 = arith.cmpi eq, %arg2, %c0_i32 : i32
    %1 = arith.extui %0 : i1 to i32
    %c0_i32_0 = arith.constant 0 : i32
    %2 = arith.cmpi ne, %1, %c0_i32_0 : i32
    scf.if %2 {
      %cst_10 = arith.constant 0.000000e+00 : f32
      %12 = vector.broadcast %cst_10 : f32 to vector<512x64xf32>
      %c0_11 = arith.constant 0 : index
      %c0_12 = arith.constant 0 : index
      %13 = vector.load %arg7[%c0_11, %c0_12] : memref<512x64xf32, #tpu.memory_space<vmem>>, vector<512x64xf32>
      tpu.vector_store %arg7[%c0_11, %c0_12], %12 {strides = array<i32>} : memref<512x64xf32, #tpu.memory_space<vmem>>, vector<512x64xf32>,
    } else {
    }
    %c0 = arith.constant 0 : index
    %c0_1 = arith.constant 0 : index
    %3 = vector.load %arg7[%c0, %c0_1] : memref<512x64xf32, #tpu.memory_space<vmem>>, vector<512x64xf32>
    %c0_2 = arith.constant 0 : index
    %c0_3 = arith.constant 0 : index
    %4 = vector.load %arg3[%c0_2, %c0_3] : memref<512x147xbf16, #tpu.memory_space<vmem>>, vector<512x147xbf16>
    %c0_4 = arith.constant 0 : index
    %c0_5 = arith.constant 0 : index
    %5 = vector.load %arg4[%c0_4, %c0_5] : memref<147x64xbf16, #tpu.memory_space<vmem>>, vector<147x64xbf16>
    %cst = arith.constant dense<0.000000e+00> : vector<512x64xf32>
    %6 = tpu.matmul %4, %5, %cst {dimension_numbers = #tpu.dot_dimension_numbers<[1], [0], [0], [1], [0, 0, 1, 1], [], []>} : vector<512x147xbf16>, vector<147x64xbf16>, vector<512x64xf32> -> vector<512x64xf32>
    %7 = arith.addf %3, %6 : vector<512x64xf32>
    %c0_6 = arith.constant 0 : index
    %c0_7 = arith.constant 0 : index
    %8 = vector.load %arg7[%c0_6, %c0_7] : memref<512x64xf32, #tpu.memory_space<vmem>>, vector<512x64xf32>
    tpu.vector_store %arg7[%c0_6, %c0_7], %7 {strides = array<i32>} : memref<512x64xf32, #tpu.memory_space<vmem>>, vector<512x64xf32>,
    %c0_i32_8 = arith.constant 0 : i32
    %9 = arith.cmpi eq, %arg2, %c0_i32_8 : i32
    %10 = arith.extui %9 : i1 to i32
    %c0_i32_9 = arith.constant 0 : i32
    %11 = arith.cmpi ne, %10, %c0_i32_9 : i32
    scf.if %11 {
      %c0_10 = arith.constant 0 : index
      %c0_11 = arith.constant 0 : index
      %12 = vector.load %arg7[%c0_10, %c0_11] : memref<512x64xf32, #tpu.memory_space<vmem>>, vector<512x64xf32>
      %c0_12 = arith.constant 0 : index
      %c0_13 = arith.constant 0 : index
      %13 = vector.load %arg5[%c0_12, %c0_13] : memref<1x64xf32, #tpu.memory_space<vmem>>, vector<1x64xf32>
      %14 = vector.broadcast %13 : vector<1x64xf32> to vector<512x64xf32>
      %15 = arith.addf %12, %14 : vector<512x64xf32>
      %cst_14 = arith.constant 0.000000e+00 : f32
      %16 = vector.broadcast %cst_14 : f32 to vector<512x64xf32>
      %17 = arith.maximumf %15, %16 : vector<512x64xf32>
      %18 = arith.truncf %17 : vector<512x64xf32> to vector<512x64xbf16>
      %c0_15 = arith.constant 0 : index
      %c0_16 = arith.constant 0 : index
      %19 = vector.load %arg6[%c0_15, %c0_16] : memref<512x64xbf16, #tpu.memory_space<vmem>>, vector<512x64xbf16>
      tpu.vector_store %arg6[%c0_15, %c0_16], %18 {strides = array<i32>} : memref<512x64xbf16, #tpu.memory_space<vmem>>, vector<512x64xbf16>,
    } else {
    }
    return
  }
  func.func @transform_0(%arg0: i32, %arg1: i32, %arg2: i32) -> (i32, i32) {
    %c0_i32 = arith.constant 0 : i32
    return %arg0, %arg2 : i32, i32
  }
  func.func @transform_1(%arg0: i32, %arg1: i32, %arg2: i32) -> (i32, i32) {
    %c0_i32 = arith.constant 0 : i32
    return %arg2, %arg1 : i32, i32
  }
  func.func @transform_2(%arg0: i32, %arg1: i32, %arg2: i32) -> (i32, i32) {
    %c0_i32 = arith.constant 0 : i32
    %c0_i32_0 = arith.constant 0 : i32
    return %c0_i32, %arg1 : i32, i32
  }
  func.func @transform_3(%arg0: i32, %arg1: i32, %arg2: i32) -> (i32, i32) {
    %c0_i32 = arith.constant 0 : i32
    return %arg0, %arg1 : i32, i32
  }
}

</mosaic_0001>

<bundles_post_ra>
// kernel: tpu_custom_call.1
= control target key start
LH: loop header
LB: loop body
LE: loop exit
PB: predicated region body
PF: predicated region fallthrough
CT: control target
= control target key end

     0   :  { %s2338_s12 = smov 0   ;;  %s2340_s13 = smov 0   ;;  %s3068_s0 = inlined_call_operand.vmem [shape: bf16[2048,147], index: 0, kind: input, shape index: {}]   ;;  %s3069_s1 = inlined_call_operand.vmem [shape: bf16[147,64], index: 1, kind: input, shape index: {}]   ;;  %s3070_s2 = inlined_call_operand.vmem [shape: f32[1,64], index: 2, kind: input, shape index: {}]   ;;  %s3071_s3 = inlined_call_operand.vmem [shape: bf16[2048,64], index: 3, kind: output, shape index: {}]  }
   0x1   :  { %s2342_s14 = smov 0  }
   0x2 LB: > { %s32_s15 = sadd.s32 1, %s2310_s13  ;;  %p1848_p0 = scmp.ge.s32.totalorder %s2314_s14, 1  ;;  %s2314_s14 = sphi %s2342_s14, %s13_s14   ;;  %s2310_s13 = sphi %s2340_s13, %s3073_s13   ;;  %s2306_s12 = sphi %s2338_s12, %s3072_s12  }
   0x3   : > { %p34_p1 = scmp.ge.s32.totalorder %s32_s15, 4  ;;  %p191_p2 = scmp.lt.s32.totalorder %s2314_s14, 5 }
   0x5   : > { %s3075_s15 = smov (%p34_p1, %s32_s15), 0  ;;  %p192_p3 = pnand %p1848_p0, %p191_p2 }
   0x6   : > { %s1849_s20 = sshll.u32 (!%p192_p3), %s2306_s12, 6 }
   0x7   : > { %195 = sbr.rel (%p192_p3) target bundleno = 445 (0x1bd), region = 32  ;;  %p236_p4 = scmp.lt.s32.totalorder (!%p192_p3), %s1849_s20, 255 }
   0xc   : > { %v2252_v0 = vld [vmem:[%s3069_s1 + $0x38] sm:$0xff]  ;;  %v483_v1 = vld [vmem:[%s3069_s1 + $0x48] sm:$0x3]  ;;  %vm926_vm0 = vcmask 1040384   ;;  %vm927_vm1 = vcmask 1041408   ;;  %v2251_v3 = vld [vmem:[%s3069_s1 + $0x30] sm:$0xff] }
   0xd   : > { %v809_v2 = vunpack.c.l.b16 %v483_v1  ;;  %933 = vmatpush.bf16.msra.mxu0 %v2252_v0  ;;  %2254 = vmatpush.bf16.msra.mxu2 %v2252_v0  ;;  %v2316_v4 = vmov 65535   ;;  %s3077_s20 = smov (!%p236_p4, %s1849_s20), 255  ;;  %v2250_v9 = vld [vmem:[%s3069_s1 + $0x28] sm:$0xff]  ;;  %v2253_v10 = vld [vmem:[%s3069_s1 + $0x40] sm:$0xff]  ;;  %vm829_vm2 = vcmask 154624   ;;  %v2248_v18 = vld [vmem:[%s3069_s1 + $0x18] sm:$0xff] }
   0xe   : > { %v928_v5 = vsel %vm926_vm0, 4294967295, %v2316_v4  ;;  %s2180_s25 = sshll.u32 %s3077_s20, 3  ;;  %v2249_v14 = vld [vmem:[%s3069_s1 + $0x20] sm:$0xff]  ;;  %v2247_v19 = vld [vmem:[%s3069_s1 + $0x10] sm:$0xff]  ;;  %v2246_v20 = vld [vmem:[%s3069_s1 + $0x8] sm:$0xff]  ;;  %vm272_vm3 = vcmask 523264  }
   0xf   : > { %v819_v6 = vpack.c.b16 %v809_v2, %v809_v2  ;;  %v929_v7 = vsel %vm927_vm1, %v928_v5, 0  ;;  %s2377_s30 = scalar_lea.vmem %s3068_s0, %s2180_s25  ;;  %v2245_v26 = vld [vmem:[%s3069_s1] sm:$0xff]  ;;  %s1853_s19 = sshll.u32 %s3077_s20, 2  ;;  %vm1663_vm4 = vcmask 519168  }
  0x10   : > { %v2181_v11 = vld [vmem:[%s2377_s30 + $0x4] sm:$0xf]  ;;  %v1858_v12 = vld [vmem:[%s2377_s30 + $0x8] sm:$0xf0]  ;;  %v2215_v15 = vld [vmem:[%s2377_s30 + $0x114] sm:$0xf]  ;;  %s2627_s22 = scalar_lea.vmem %s3071_s3, %s1853_s19 }
  0x11   : > { %v931_v8 = vand.u32 %v929_v7, %v819_v6  ;;  %934 = vmatpush.bf16.msra.mxu0 %v2251_v3  ;;  %2255 = vmatpush.bf16.msra.mxu2 %v2251_v3  ;;  %v1861_v13 = vor.u32 %v2181_v11, %v1858_v12  ;;  %v1994_v16 = vld [vmem:[%s2377_s30 + $0x118] sm:$0xf0]  ;;  %v2183_v21 = vld [vmem:[%s2377_s30 + $0x14] sm:$0xf]  ;;  %v2217_v23 = vld [vmem:[%s2377_s30 + $0x124] sm:$0xf] }
  0x12   : > { %v1997_v17 = vor.u32 %v2215_v15, %v1994_v16  ;;  %v1866_v22 = vld [vmem:[%s2377_s30 + $0x18] sm:$0xf0]  ;;  %v2002_v24 = vld [vmem:[%s2377_s30 + $0x128] sm:$0xf0]  ;;  %v1856_v27 = vld [vmem:[%s2377_s30] sm:$0xf] }
  0x13   : > { %1108 = vmatpush.bf16.msra.mxu1 %v931_v8  ;;  %2262 = vmatpush.bf16.msra.mxu3 %v931_v8  ;;  %v1869_v25 = vor.u32 %v2183_v21, %v1866_v22  ;;  %v2182_v28 = vld [vmem:[%s2377_s30 + $0x4] sm:$0xf0]  ;;  %v1984_v29 = vld [vmem:[%s2377_s30 + $0x100] sm:$0xf]  ;;  %v2005_v31 = vor.u32 %v2217_v23, %v2002_v24  ;;  %v2185_v34 = vld [vmem:[%s2377_s30 + $0x24] sm:$0xf] }
  0x14   : > { %v2214_v30 = vld [vmem:[%s2377_s30 + $0x104] sm:$0xf0]  ;;  %v1857_v32 = vor.u32 %v2182_v28, %v1856_v27  ;;  %v1874_v35 = vld [vmem:[%s2377_s30 + $0x28] sm:$0xf0]  ;;  %v2219_v36 = vld [vmem:[%s2377_s30 + $0x134] sm:$0xf] }
  0x15   : > { %935 = vmatpush.bf16.msra.mxu0 %v2250_v9  ;;  %2256 = vmatpush.bf16.msra.mxu2 %v2250_v9  ;;  %v1985_v33 = vor.u32 %v2214_v30, %v1984_v29  ;;  %v2010_v37 = vld [vmem:[%s2377_s30 + $0x138] sm:$0xf0]  ;;  %v1877_v38 = vor.u32 %v2185_v34, %v1874_v35  ;;  %v1864_v39 = vld [vmem:[%s2377_s30 + $0x10] sm:$0xf]  ;;  %v2184_v40 = vld [vmem:[%s2377_s30 + $0x14] sm:$0xf0] }
  0x16   : > { %v1992_v41 = vld [vmem:[%s2377_s30 + $0x110] sm:$0xf]  ;;  %v2216_v42 = vld [vmem:[%s2377_s30 + $0x114] sm:$0xf0]  ;;  %v2013_v43 = vor.u32 %v2219_v36, %v2010_v37  ;;  %v1865_v44 = vor.u32 %v2184_v40, %v1864_v39  ;;  %v2187_v46 = vld [vmem:[%s2377_s30 + $0x34] sm:$0xf] }
  0x17   : > { %1109 = vmatpush.bf16.msra.mxu1 %v2253_v10  ;;  %2263 = vmatpush.bf16.msra.mxu3 %v2253_v10  ;;  %v1993_v45 = vor.u32 %v2216_v42, %v1992_v41  ;;  %v1882_v47 = vld [vmem:[%s2377_s30 + $0x38] sm:$0xf0]  ;;  %v2221_v48 = vld [vmem:[%s2377_s30 + $0x144] sm:$0xf]  ;;  %v2018_v49 = vld [vmem:[%s2377_s30 + $0x148] sm:$0xf0] }
  0x18   : > { %v1885_v50 = vor.u32 %v2187_v46, %v1882_v47  ;;  %v1872_v51 = vld [vmem:[%s2377_s30 + $0x20] sm:$0xf]  ;;  %v2186_v52 = vld [vmem:[%s2377_s30 + $0x24] sm:$0xf0]  ;;  %v2021_v55 = vor.u32 %v2221_v48, %v2018_v49  ;;  %v2189_v58 = vld [vmem:[%s2377_s30 + $0x44] sm:$0xf] }
  0x19   : > { %936 = vmatpush.bf16.msra.mxu0 %v2249_v14  ;;  %2257 = vmatpush.bf16.msra.mxu2 %v2249_v14  ;;  %v2000_v53 = vld [vmem:[%s2377_s30 + $0x120] sm:$0xf]  ;;  %v2218_v54 = vld [vmem:[%s2377_s30 + $0x124] sm:$0xf0]  ;;  %v1873_v56 = vor.u32 %v2186_v52, %v1872_v51  ;;  %v1890_v59 = vld [vmem:[%s2377_s30 + $0x48] sm:$0xf0] }
  0x1a   : > { %2146 = vmatmul.msk.bf16.vlgmr.msra.gmra.mxu1 %vm829_vm2, %v1861_v13  ;;  %2163 = vmatmul.msk.bf16.vlgmr.msra.gmra.mxu3 %vm829_vm2, %v1997_v17  ;;  %v2001_v57 = vor.u32 %v2218_v54, %v2000_v53  ;;  %v2223_v60 = vld [vmem:[%s2377_s30 + $0x154] sm:$0xf]  ;;  %v2026_v61 = vld [vmem:[%s2377_s30 + $0x158] sm:$0xf0]  ;;  %v1893_v62 = vor.u32 %v2189_v58, %v1890_v59  ;;  %v1880_v63 = vld [vmem:[%s2377_s30 + $0x30] sm:$0xf] }
  0x1b   : > { %v2188_v0 = vld [vmem:[%s2377_s30 + $0x34] sm:$0xf0]  ;;  %v2008_v1 = vld [vmem:[%s2377_s30 + $0x130] sm:$0xf]  ;;  %v2029_v3 = vor.u32 %v2223_v60, %v2026_v61  ;;  %v2191_v6 = vld [vmem:[%s2377_s30 + $0x54] sm:$0xf] }
  0x1c   : > { %v2220_v2 = vld [vmem:[%s2377_s30 + $0x134] sm:$0xf0]  ;;  %v1881_v4 = vor.u32 %v2188_v0, %v1880_v63  ;;  %v1898_v7 = vld [vmem:[%s2377_s30 + $0x58] sm:$0xf0]  ;;  %v2225_v8 = vld [vmem:[%s2377_s30 + $0x164] sm:$0xf] }
  0x1d   : > { %937 = vmatpush.bf16.msra.mxu0 %v2248_v18  ;;  %2258 = vmatpush.bf16.msra.mxu2 %v2248_v18  ;;  %v2009_v5 = vor.u32 %v2220_v2, %v2008_v1  ;;  %v2034_v9 = vld [vmem:[%s2377_s30 + $0x168] sm:$0xf0]  ;;  %v1901_v10 = vor.u32 %v2191_v6, %v1898_v7  ;;  %v1888_v11 = vld [vmem:[%s2377_s30 + $0x40] sm:$0xf]  ;;  %v2190_v12 = vld [vmem:[%s2377_s30 + $0x44] sm:$0xf0] }
  0x1e   : > { %v2016_v13 = vld [vmem:[%s2377_s30 + $0x140] sm:$0xf]  ;;  %v2222_v14 = vld [vmem:[%s2377_s30 + $0x144] sm:$0xf0]  ;;  %v2037_v15 = vor.u32 %v2225_v8, %v2034_v9  ;;  %v1889_v16 = vor.u32 %v2190_v12, %v1888_v11  ;;  %v2193_v18 = vld [vmem:[%s2377_s30 + $0x64] sm:$0xf] }
  0x1f   : > { %v2017_v17 = vor.u32 %v2222_v14, %v2016_v13  ;;  %v2042_v21 = vld [vmem:[%s2377_s30 + $0x178] sm:$0xf0]  ;;  %v1896_v23 = vld [vmem:[%s2377_s30 + $0x50] sm:$0xf]  ;;  %v2192_v24 = vld [vmem:[%s2377_s30 + $0x54] sm:$0xf0] }
  0x20   : > { %v1897_v28 = vor.u32 %v2192_v24, %v1896_v23  ;;  %v2195_v30 = vld [vmem:[%s2377_s30 + $0x74] sm:$0xf]  ;;  %v1904_v35 = vld [vmem:[%s2377_s30 + $0x60] sm:$0xf]  ;;  %v2194_v36 = vld [vmem:[%s2377_s30 + $0x64] sm:$0xf0] }
  0x21   : > { %938 = vmatpush.bf16.msra.mxu0 %v2247_v19  ;;  %2259 = vmatpush.bf16.msra.mxu2 %v2247_v19  ;;  %v1906_v19 = vld [vmem:[%s2377_s30 + $0x68] sm:$0xf0]  ;;  %v2317_v37 = vmov 0.0   ;;  %v2226_v39 = vld [vmem:[%s2377_s30 + $0x164] sm:$0xf0]  ;;  %v1905_v41 = vor.u32 %v2194_v36, %v1904_v35 }
  0x22   : > { %v1909_v22 = vor.u32 %v2193_v18, %v1906_v19  ;;  %273 = vst.msk [vmem:[#allocation2] sm:$0xff] %vm272_vm3, %v2317_v37  ;;  %v1912_v46 = vld [vmem:[%s2377_s30 + $0x70] sm:$0xf]  ;;  %v2196_v47 = vld [vmem:[%s2377_s30 + $0x74] sm:$0xf0] }
  0x23   : > { %274 = vst.msk [vmem:[#allocation2 + $0x8] sm:$0xff] %vm272_vm3, %v2317_v37  ;;  %v2040_v49 = vld [vmem:[%s2377_s30 + $0x170] sm:$0xf]  ;;  %v1913_v51 = vor.u32 %v2196_v47, %v1912_v46  ;;  %v2199_v54 = vld [vmem:[%s2377_s30 + $0x94] sm:$0xf] }
  0x24   : > { %275 = vst.msk [vmem:[#allocation2 + $0x10] sm:$0xff] %vm272_vm3, %v2317_v37  ;;  %v1920_v60 = vld [vmem:[%s2377_s30 + $0x80] sm:$0xf]  ;;  %v2198_v61 = vld [vmem:[%s2377_s30 + $0x84] sm:$0xf0] }
  0x25   : > { %939 = vmatpush.bf16.msra.mxu0 %v2246_v20  ;;  %2260 = vmatpush.bf16.msra.mxu2 %v2246_v20  ;;  %v2227_v20 = vld [vmem:[%s2377_s30 + $0x174] sm:$0xf]  ;;  %276 = vst.msk [vmem:[#allocation2 + $0x18] sm:$0xff] %vm272_vm3, %v2317_v37  ;;  %v2048_v63 = vld [vmem:[%s2377_s30 + $0x180] sm:$0xf]  ;;  %v1921_v1 = vor.u32 %v2198_v61, %v1920_v60 }
  0x26   : > { %v2045_v27 = vor.u32 %v2227_v20, %v2042_v21  ;;  %277 = vst.msk [vmem:[#allocation2 + $0x20] sm:$0xff] %vm272_vm3, %v2317_v37  ;;  %v2230_v0 = vld [vmem:[%s2377_s30 + $0x184] sm:$0xf0]  ;;  %v2583_v9 = vld [vmem:[%s3070_s2] ss:$0 sm:$0xff] }
  0x27   : > { %278 = vst.msk [vmem:[#allocation2 + $0x28] sm:$0xff] %vm272_vm3, %v2317_v37  ;;  %v2201_v13 = vld [vmem:[%s2377_s30 + $0xa4] sm:$0xf]  ;;  %v1938_v14 = vld [vmem:[%s2377_s30 + $0xa8] sm:$0xf0] }
  0x28   : > { %279 = vst.msk [vmem:[#allocation2 + $0x30] sm:$0xff] %vm272_vm3, %v2317_v37  ;;  %v1941_v19 = vor.u32 %v2201_v13, %v1938_v14  ;;  %v1928_v20 = vld [vmem:[%s2377_s30 + $0x90] sm:$0xf]  ;;  %v2200_v21 = vld [vmem:[%s2377_s30 + $0x94] sm:$0xf0] }
  0x29   : > { %940 = vmatpush.bf16.msra.mxu0 %v2245_v26  ;;  %2261 = vmatpush.bf16.msra.mxu2 %v2245_v26  ;;  %v2224_v26 = vld [vmem:[%s2377_s30 + $0x154] sm:$0xf0]  ;;  %280 = vst.msk [vmem:[#allocation2 + $0x38] sm:$0xff] %vm272_vm3, %v2317_v37  ;;  %v2056_v24 = vld [vmem:[%s2377_s30 + $0x190] sm:$0xf] }
  0x2a   : > { %2147 = vmatmul.msk.bf16.gmra.mxu1 %vm829_vm2, %v1869_v25  ;;  %2164 = vmatmul.msk.bf16.gmra.mxu3 %vm829_vm2, %v2005_v31  ;;  %v2024_v25 = vld [vmem:[%s2377_s30 + $0x150] sm:$0xf]  ;;  %v1914_v31 = vld [vmem:[%s2377_s30 + $0x78] sm:$0xf0]  ;;  %281 = vst.msk [vmem:[#allocation2 + $0x40] sm:$0xff] %vm272_vm3, %v2317_v37  ;;  %v338_v35 = vld [vmem:[#allocation2 + $0x8] sm:$0xff] }
  0x2b   : > { %v2025_v29 = vor.u32 %v2224_v26, %v2024_v25  ;;  %v1917_v34 = vor.u32 %v2195_v30, %v1914_v31  ;;  %282 = vst.msk [vmem:[#allocation2 + $0x48] sm:$0xff] %vm272_vm3, %v2317_v37  ;;  %v2232_v25 = vld [vmem:[%s2377_s30 + $0x194] sm:$0xf0]  ;;  %v2235_v47 = vld [vmem:[%s2377_s30 + $0x1b4] sm:$0xf] }
  0x2c   : > { %941 = vmatmul.bf16.vlgmr.msra.gmra.mxu0 %v1857_v32  ;;  %1021 = vmatmul.bf16.vlgmr.msra.gmra.mxu2 %v1985_v33  ;;  %v2229_v32 = vld [vmem:[%s2377_s30 + $0x184] sm:$0xf]  ;;  %v2050_v33 = vld [vmem:[%s2377_s30 + $0x188] sm:$0xf0]  ;;  %283 = vst.msk [vmem:[#allocation2 + $0x50] sm:$0xff] %vm272_vm3, %v2317_v37  ;;  %v2057_v31 = vor.u32 %v2232_v25, %v2056_v24 }
  0x2d   : > { %v2053_v40 = vor.u32 %v2229_v32, %v2050_v33  ;;  %284 = vst.msk [vmem:[#allocation2 + $0x58] sm:$0xff] %vm272_vm3, %v2317_v37  ;;  %v2234_v60 = vld [vmem:[%s2377_s30 + $0x1a4] sm:$0xf0] }
  0x2e   : > { %285 = vst.msk [vmem:[#allocation2 + $0x60] sm:$0xff] %vm272_vm3, %v2317_v37 }
  0x2f   : > { %286 = vst.msk [vmem:[#allocation2 + $0x68] sm:$0xff] %vm272_vm3, %v2317_v37 }
  0x30   : > { %287 = vst.msk [vmem:[#allocation2 + $0x70] sm:$0xff] %vm272_vm3, %v2317_v37 }
  0x31   : > { %288 = vst.msk [vmem:[#allocation2 + $0x78] sm:$0xff] %vm272_vm3, %v2317_v37 }
  0x32   : > { %289 = vst.msk [vmem:[#allocation2 + $0x80] sm:$0xff] %vm272_vm3, %v2317_v37 }
  0x33   : > { %290 = vst.msk [vmem:[#allocation2 + $0x88] sm:$0xff] %vm272_vm3, %v2317_v37 }
  0x34   : > { %291 = vst.msk [vmem:[#allocation2 + $0x90] sm:$0xff] %vm272_vm3, %v2317_v37 }
  0x35   : > { %292 = vst.msk [vmem:[#allocation2 + $0x98] sm:$0xff] %vm272_vm3, %v2317_v37 }
  0x36   : > { %293 = vst.msk [vmem:[#allocation2 + $0xa0] sm:$0xff] %vm272_vm3, %v2317_v37 }
  0x37   : > { %294 = vst.msk [vmem:[#allocation2 + $0xa8] sm:$0xff] %vm272_vm3, %v2317_v37 }
  0x38   : > { %295 = vst.msk [vmem:[#allocation2 + $0xb0] sm:$0xff] %vm272_vm3, %v2317_v37 }
  0x39   : > { %296 = vst.msk [vmem:[#allocation2 + $0xb8] sm:$0xff] %vm272_vm3, %v2317_v37 }
  0x3a   : > { %2148 = vmatmul.msk.bf16.gmra.mxu1 %vm829_vm2, %v1877_v38  ;;  %2165 = vmatmul.msk.bf16.gmra.mxu3 %vm829_vm2, %v2013_v43  ;;  %v2032_v38 = vld [vmem:[%s2377_s30 + $0x160] sm:$0xf]  ;;  %v2197_v43 = vld [vmem:[%s2377_s30 + $0x84] sm:$0xf]  ;;  %297 = vst.msk [vmem:[#allocation2 + $0xc0] sm:$0xff] %vm272_vm3, %v2317_v37 }
  0x3b   : > { %v2033_v42 = vor.u32 %v2226_v39, %v2032_v38  ;;  %298 = vst.msk [vmem:[#allocation2 + $0xc8] sm:$0xff] %vm272_vm3, %v2317_v37 }
  0x3c   : > { %946 = vmatmul.bf16.gmra.mxu0 %v1865_v44  ;;  %1026 = vmatmul.bf16.gmra.mxu2 %v1993_v45  ;;  %v1922_v44 = vld [vmem:[%s2377_s30 + $0x88] sm:$0xf0]  ;;  %299 = vst.msk [vmem:[#allocation2 + $0xd0] sm:$0xff] %vm272_vm3, %v2317_v37 }
  0x3d   : > { %v1925_v45 = vor.u32 %v2197_v43, %v1922_v44  ;;  %300 = vst.msk [vmem:[#allocation2 + $0xd8] sm:$0xff] %vm272_vm3, %v2317_v37  ;;  %v2203_v43 = vld [vmem:[%s2377_s30 + $0xb4] sm:$0xf]  ;;  %v1946_v44 = vld [vmem:[%s2377_s30 + $0xb8] sm:$0xf0] }
  0x3e   : > { %301 = vst.msk [vmem:[#allocation2 + $0xe0] sm:$0xff] %vm272_vm3, %v2317_v37 }
  0x3f   : > { %302 = vst.msk [vmem:[#allocation2 + $0xe8] sm:$0xff] %vm272_vm3, %v2317_v37 }
  0x40   : > { %303 = vst.msk [vmem:[#allocation2 + $0xf0] sm:$0xff] %vm272_vm3, %v2317_v37 }
  0x41   : > { %304 = vst.msk [vmem:[#allocation2 + $0xf8] sm:$0xff] %vm272_vm3, %v2317_v37 }
  0x42   : > { %305 = vst.msk [vmem:[#allocation2 + $0x100] sm:$0xff] %vm272_vm3, %v2317_v37 }
  0x43   : > { %306 = vst.msk [vmem:[#allocation2 + $0x108] sm:$0xff] %vm272_vm3, %v2317_v37 }
  0x44   : > { %307 = vst.msk [vmem:[#allocation2 + $0x110] sm:$0xff] %vm272_vm3, %v2317_v37 }
  0x45   : > { %308 = vst.msk [vmem:[#allocation2 + $0x118] sm:$0xff] %vm272_vm3, %v2317_v37 }
  0x46   : > { %309 = vst.msk [vmem:[#allocation2 + $0x120] sm:$0xff] %vm272_vm3, %v2317_v37 }
  0x47   : > { %310 = vst.msk [vmem:[#allocation2 + $0x128] sm:$0xff] %vm272_vm3, %v2317_v37 }
  0x48   : > { %311 = vst.msk [vmem:[#allocation2 + $0x130] sm:$0xff] %vm272_vm3, %v2317_v37 }
  0x49   : > { %312 = vst.msk [vmem:[#allocation2 + $0x138] sm:$0xff] %vm272_vm3, %v2317_v37 }
  0x4a   : > { %2149 = vmatmul.msk.bf16.gmra.mxu1 %vm829_vm2, %v1885_v50  ;;  %2166 = vmatmul.msk.bf16.gmra.mxu3 %vm829_vm2, %v2021_v55  ;;  %v2228_v50 = vld [vmem:[%s2377_s30 + $0x174] sm:$0xf0]  ;;  %v1930_v55 = vld [vmem:[%s2377_s30 + $0x98] sm:$0xf0]  ;;  %313 = vst.msk [vmem:[#allocation2 + $0x140] sm:$0xff] %vm272_vm3, %v2317_v37 }
  0x4b   : > { %v2041_v52 = vor.u32 %v2228_v50, %v2040_v49  ;;  %v1933_v59 = vor.u32 %v2199_v54, %v1930_v55  ;;  %314 = vst.msk [vmem:[#allocation2 + $0x148] sm:$0xff] %vm272_vm3, %v2317_v37  ;;  %v340_v50 = vld [vmem:[#allocation2 + $0x18] sm:$0xff]  ;;  %v1949_v54 = vor.u32 %v2203_v43, %v1946_v44  ;;  %v1936_v55 = vld [vmem:[%s2377_s30 + $0xa0] sm:$0xf] }
  0x4c   : > { %951 = vmatmul.bf16.gmra.mxu0 %v1873_v56  ;;  %1031 = vmatmul.bf16.gmra.mxu2 %v2001_v57  ;;  %v2231_v56 = vld [vmem:[%s2377_s30 + $0x194] sm:$0xf]  ;;  %v2058_v57 = vld [vmem:[%s2377_s30 + $0x198] sm:$0xf0]  ;;  %315 = vst.msk [vmem:[#allocation2 + $0x150] sm:$0xff] %vm272_vm3, %v2317_v37 }
  0x4d   : > { %v2061_v58 = vor.u32 %v2231_v56, %v2058_v57  ;;  %316 = vst.msk [vmem:[#allocation2 + $0x158] sm:$0xff] %vm272_vm3, %v2317_v37  ;;  %v2202_v56 = vld [vmem:[%s2377_s30 + $0xa4] sm:$0xf0]  ;;  %v372_v61 = vld [vmem:[#allocation2 + $0x118] sm:$0xff] }
  0x4e   : > { %317 = vst.msk [vmem:[#allocation2 + $0x160] sm:$0xff] %vm272_vm3, %v2317_v37 }
  0x4f   : > { %318 = vst.msk [vmem:[#allocation2 + $0x168] sm:$0xff] %vm272_vm3, %v2317_v37 }
  0x50   : > { %319 = vst.msk [vmem:[#allocation2 + $0x170] sm:$0xff] %vm272_vm3, %v2317_v37 }
  0x51   : > { %320 = vst.msk [vmem:[#allocation2 + $0x178] sm:$0xff] %vm272_vm3, %v2317_v37 }
  0x52   : > { %321 = vst.msk [vmem:[#allocation2 + $0x180] sm:$0xff] %vm272_vm3, %v2317_v37 }
  0x53   : > { %322 = vst.msk [vmem:[#allocation2 + $0x188] sm:$0xff] %vm272_vm3, %v2317_v37 }
  0x54   : > { %323 = vst.msk [vmem:[#allocation2 + $0x190] sm:$0xff] %vm272_vm3, %v2317_v37 }
  0x55   : > { %324 = vst.msk [vmem:[#allocation2 + $0x198] sm:$0xff] %vm272_vm3, %v2317_v37 }
  0x56   : > { %325 = vst.msk [vmem:[#allocation2 + $0x1a0] sm:$0xff] %vm272_vm3, %v2317_v37 }
  0x57   : > { %326 = vst.msk [vmem:[#allocation2 + $0x1a8] sm:$0xff] %vm272_vm3, %v2317_v37 }
  0x58   : > { %327 = vst.msk [vmem:[#allocation2 + $0x1b0] sm:$0xff] %vm272_vm3, %v2317_v37 }
  0x59   : > { %328 = vst.msk [vmem:[#allocation2 + $0x1b8] sm:$0xff] %vm272_vm3, %v2317_v37 }
  0x5a   : > { %2150 = vmatmul.msk.bf16.gmra.mxu1 %vm829_vm2, %v1893_v62  ;;  %2167 = vmatmul.msk.bf16.gmra.mxu3 %vm829_vm2, %v2029_v3  ;;  %v337_v3 = vld [vmem:[#allocation2] sm:$0xff]  ;;  %329 = vst.msk [vmem:[#allocation2 + $0x1c0] sm:$0xff] %vm272_vm3, %v2317_v37 }
  0x5b   : > { %330 = vst.msk [vmem:[#allocation2 + $0x1c8] sm:$0xff] %vm272_vm3, %v2317_v37 }
  0x5c   : > { %956 = vmatmul.bf16.gmra.mxu0 %v1881_v4  ;;  %1036 = vmatmul.bf16.gmra.mxu2 %v2009_v5  ;;  %v2049_v5 = vor.u32 %v2230_v0, %v2048_v63  ;;  %331 = vst.msk [vmem:[#allocation2 + $0x1d0] sm:$0xff] %vm272_vm3, %v2317_v37  ;;  %v1937_v63 = vor.u32 %v2202_v56, %v1936_v55  ;;  %v374_v55 = vld [vmem:[#allocation2 + $0x128] sm:$0xff] }
  0x5d   : > { %332 = vst.msk [vmem:[#allocation2 + $0x1d8] sm:$0xff] %vm272_vm3, %v2317_v37 }
  0x5e   : > { %333 = vst.msk [vmem:[#allocation2 + $0x1e0] sm:$0xff] %vm272_vm3, %v2317_v37 }
  0x5f   : > { %334 = vst.msk [vmem:[#allocation2 + $0x1e8] sm:$0xff] %vm272_vm3, %v2317_v37 }
  0x60   : > { %335 = vst.msk [vmem:[#allocation2 + $0x1f0] sm:$0xff] %vm272_vm3, %v2317_v37 }
  0x61   : > { %336 = vst.msk [vmem:[#allocation2 + $0x1f8] sm:$0xff] %vm272_vm3, %v2317_v37  ;;  %v341_v37 = vld [vmem:[#allocation2 + $0x20] sm:$0xff] }
  0x6a   : > { %2151 = vmatmul.msk.bf16.gmra.mxu1 %vm829_vm2, %v1901_v10  ;;  %2168 = vmatmul.msk.bf16.gmra.mxu3 %vm829_vm2, %v2037_v15  ;;  %v2233_v15 = vld [vmem:[%s2377_s30 + $0x1a4] sm:$0xf] }
  0x6c   : > { %961 = vmatmul.bf16.gmra.mxu0 %v1889_v16  ;;  %1041 = vmatmul.bf16.gmra.mxu2 %v2017_v17  ;;  %v2066_v16 = vld [vmem:[%s2377_s30 + $0x1a8] sm:$0xf0] }
  0x6d   : > { %v2069_v17 = vor.u32 %v2233_v15, %v2066_v16 }
  0x7a   : > { %2152 = vmatmul.msk.bf16.gmra.mxu1 %vm829_vm2, %v1909_v22  ;;  %2169 = vmatmul.msk.bf16.gmra.mxu3 %vm829_vm2, %v2045_v27 }
  0x7c   : > { %966 = vmatmul.bf16.gmra.mxu0 %v1897_v28  ;;  %1046 = vmatmul.bf16.gmra.mxu2 %v2025_v29  ;;  %v1929_v28 = vor.u32 %v2200_v21, %v1928_v20 }
  0x8a   : > { %2153 = vmatmul.msk.bf16.gmra.mxu1 %vm829_vm2, %v1917_v34  ;;  %2170 = vmatmul.msk.bf16.gmra.mxu3 %vm829_vm2, %v2053_v40  ;;  %v339_v40 = vld [vmem:[#allocation2 + $0x10] sm:$0xff] }
  0x8c   : > { %971 = vmatmul.bf16.gmra.mxu0 %v1905_v41  ;;  %1051 = vmatmul.bf16.gmra.mxu2 %v2033_v42 }
  0x97   : > { %v1111_v48 = vpop.f32.mrf.mxu1 }
  0x9a   : > { %2154 = vmatmul.msk.bf16.gmra.mxu1 %vm829_vm2, %v1925_v45  ;;  %2171 = vmatmul.msk.bf16.gmra.mxu3 %vm829_vm2, %v2061_v58  ;;  %v371_v45 = vld [vmem:[#allocation2 + $0x110] sm:$0xff] }
  0x9c   : > { %976 = vmatmul.bf16.gmra.mxu0 %v1913_v51  ;;  %1056 = vmatmul.bf16.gmra.mxu2 %v2041_v52 }
  0x9d   : > { %v2562_v2 = vpop.f32.mrf.mxu3 }
  0x9f   : > { %v2527_v53 = vpop.f32.mrf.mxu1 }
  0xa5   : > { %v2589_v11 = vpop.f32.mrf.mxu3 }
  0xa7   : > { %v2552_v62 = vpop.f32.mrf.mxu1 }
  0xa9   : > { %v942_v4 = vpop.f32.mrf.mxu0 }
  0xaa   : > { %2155 = vmatmul.msk.bf16.gmra.mxu1 %vm829_vm2, %v1933_v59  ;;  %v1112_v6 = vadd.f32 %v1111_v48, %v942_v4  ;;  %2172 = vmatmul.msk.bf16.gmra.mxu3 %vm829_vm2, %v2069_v17  ;;  %v2074_v48 = vld [vmem:[%s2377_s30 + $0x1b8] sm:$0xf0]  ;;  %v2064_v59 = vld [vmem:[%s2377_s30 + $0x1a0] sm:$0xf] }
  0xab   : > { %v2077_v51 = vor.u32 %v2235_v47, %v2074_v48 }
  0xac   : > { %v1271_v7 = vadd.f32 %v1112_v6, %v337_v3  ;;  %981 = vmatmul.bf16.gmra.mxu0 %v1921_v1  ;;  %1061 = vmatmul.bf16.gmra.mxu2 %v2049_v5  ;;  %v2065_v3 = vor.u32 %v2234_v60, %v2064_v59 }
  0xad   : > { %v2622_v29 = vpop.f32.mrf.mxu3 }
  0xae   : > { %1336 = vst.msk [vmem:[#allocation2] sm:$0xff] %vm272_vm3, %v1271_v7 }
  0xaf   : > { %v2576_v8 = vpop.f32.mrf.mxu1  ;;  %v2587_v10 = vpop.f32.mrf.mxu2 }
  0xb1   : > { %v944_v12 = vpop.f32.mrf.mxu0 }
  0xb2   : > { %v1114_v34 = vadd.f32 %v2527_v53, %v944_v12 }
  0xb4   : > { %v1272_v49 = vadd.f32 %v1114_v34, %v338_v35  ;;  %v342_v35 = vld [vmem:[#allocation2 + $0x28] sm:$0xff] }
  0xb5   : > { %v1403_v18 = vld [vmem:[#allocation2] sm:$0xff]  ;;  %v2650_v39 = vpop.f32.mrf.mxu3 }
  0xb6   : > { %v1471_v22 = vadd.f32 %v2583_v9, %v1403_v18  ;;  %1337 = vst.msk [vmem:[#allocation2 + $0x8] sm:$0xff] %vm272_vm3, %v1272_v49 }
  0xb7   : > { %v2612_v23 = vpop.f32.mrf.mxu1  ;;  %v2620_v27 = vpop.f32.mrf.mxu2 }
  0xb8   : > { %v1535_v26 = vmax.f32 %v1471_v22, 0.0  ;;  %v2205_v22 = vld [vmem:[%s2377_s30 + $0xc4] sm:$0xf] }
  0xb9   : > { %v947_v30 = vpop.f32.mrf.mxu0 }
  0xba   : > { %2156 = vmatmul.msk.bf16.gmra.mxu1 %vm829_vm2, %v1941_v19  ;;  %v1599_v32 = vpack.c.bf16 %v1535_v26, %v1535_v26  ;;  %v1117_v36 = vadd.f32 %v2552_v62, %v947_v30  ;;  %2173 = vmatmul.msk.bf16.gmra.mxu3 %vm829_vm2, %v2077_v51  ;;  %v373_v26 = vld [vmem:[#allocation2 + $0x120] sm:$0xff]  ;;  %v2072_v51 = vld [vmem:[%s2377_s30 + $0x1b0] sm:$0xf] }
  0xbb   : > { %v2237_v30 = vld [vmem:[%s2377_s30 + $0x1c4] sm:$0xf] }
  0xbc   : > { %1664 = vst.msk [vmem:[%s2627_s22] sm:$0xf] %vm1663_vm4, %v1599_v32  ;;  %986 = vmatmul.bf16.gmra.mxu0 %v1929_v28  ;;  %1066 = vmatmul.bf16.gmra.mxu2 %v2057_v31  ;;  %v1273_v52 = vadd.f32 %v1117_v36, %v339_v40  ;;  %v2082_v31 = vld [vmem:[%s2377_s30 + $0x1c8] sm:$0xf0] }
  0xbd   : > { %v2679_v0 = vpop.f32.mrf.mxu3  ;;  %v1404_v7 = vld [vmem:[#allocation2 + $0x8] sm:$0xff]  ;;  %v2085_v36 = vor.u32 %v2237_v30, %v2082_v31 }
  0xbe   : > { %1338 = vst.msk [vmem:[#allocation2 + $0x10] sm:$0xff] %vm272_vm3, %v1273_v52  ;;  %v2236_v52 = vld [vmem:[%s2377_s30 + $0x1b4] sm:$0xf0] }
  0xbf   : > { %v2642_v33 = vpop.f32.mrf.mxu1  ;;  %v1027_v38 = vpop.f32.mrf.mxu2 }
  0xc0   : > { %v1197_v41 = vadd.f32 %v2562_v2, %v1027_v38 }
  0xc1   : > { %v949_v42 = vpop.f32.mrf.mxu0 }
  0xc2   : > { %v1119_v46 = vadd.f32 %v2576_v8, %v949_v42  ;;  %v1305_v53 = vadd.f32 %v1197_v41, %v371_v45  ;;  %v1944_v42 = vld [vmem:[%s2377_s30 + $0xb0] sm:$0xf] }
  0xc4   : > { %v1274_v57 = vadd.f32 %v1119_v46, %v340_v50  ;;  %1370 = vst.msk [vmem:[#allocation2 + $0x110] sm:$0xff] %vm272_vm3, %v1305_v53  ;;  %v2204_v46 = vld [vmem:[%s2377_s30 + $0xb4] sm:$0xf0] }
  0xc5   : > { %v1405_v12 = vld [vmem:[#allocation2 + $0x10] sm:$0xff]  ;;  %v2692_v16 = vpop.f32.mrf.mxu3 }
  0xc6   : > { %1339 = vst.msk [vmem:[#allocation2 + $0x18] sm:$0xff] %vm272_vm3, %v1274_v57  ;;  %v1473_v13 = vadd.f32 %v2583_v9, %v1405_v12  ;;  %v1945_v57 = vor.u32 %v2204_v46, %v1944_v42 }
  0xc7   : > { %v2673_v58 = vpop.f32.mrf.mxu1  ;;  %v1029_v62 = vpop.f32.mrf.mxu2 }
  0xc8   : > { %v1199_v1 = vadd.f32 %v2589_v11, %v1029_v62  ;;  %v1472_v11 = vadd.f32 %v2583_v9, %v1404_v7  ;;  %v1537_v24 = vmax.f32 %v1473_v13, 0.0  ;;  %v343_v62 = vld [vmem:[#allocation2 + $0x30] sm:$0xff] }
  0xc9   : > { %v952_v2 = vpop.f32.mrf.mxu0 }
  0xca   : > { %2157 = vmatmul.msk.bf16.gmra.mxu1 %vm829_vm2, %v1949_v54  ;;  %v1122_v4 = vadd.f32 %v2612_v23, %v952_v2  ;;  %v1306_v5 = vadd.f32 %v1199_v1, %v372_v61  ;;  %v1536_v17 = vmax.f32 %v1472_v11, 0.0  ;;  %v1954_v23 = vld [vmem:[%s2377_s30 + $0xc8] sm:$0xf0]  ;;  %2174 = vmatmul.msk.bf16.gmra.mxu3 %vm829_vm2, %v2085_v36  ;;  %v2073_v1 = vor.u32 %v2236_v52, %v2072_v51 }
  0xcb   : > { %v1437_v14 = vld [vmem:[#allocation2 + $0x110] sm:$0xff]  ;;  %v1957_v41 = vor.u32 %v2205_v22, %v1954_v23  ;;  %v2090_v22 = vld [vmem:[%s2377_s30 + $0x1d8] sm:$0xf0] }
  0xcc   : > { %v1275_v6 = vadd.f32 %v1122_v4, %v341_v37  ;;  %991 = vmatmul.bf16.gmra.mxu0 %v1937_v63  ;;  %1371 = vst.msk [vmem:[#allocation2 + $0x118] sm:$0xff] %vm272_vm3, %v1306_v5  ;;  %1071 = vmatmul.bf16.gmra.mxu2 %v2065_v3  ;;  %v1505_v18 = vadd.f32 %v2583_v9, %v1437_v14  ;;  %v344_v14 = vld [vmem:[#allocation2 + $0x38] sm:$0xff] }
  0xcd   : > { %v1406_v19 = vld [vmem:[#allocation2 + $0x18] sm:$0xff]  ;;  %v1600_v32 = vpack.c.bf16 %v1536_v17, %v1536_v17  ;;  %v2719_v59 = vpop.f32.mrf.mxu3  ;;  %v2207_v17 = vld [vmem:[%s2377_s30 + $0xd4] sm:$0xf] }
  0xce   : > { %1340 = vst.msk [vmem:[#allocation2 + $0x20] sm:$0xff] %vm272_vm3, %v1275_v6  ;;  %v1474_v25 = vadd.f32 %v2583_v9, %v1406_v19  ;;  %v1569_v34 = vmax.f32 %v1505_v18, 0.0 }
  0xcf   : > { %v2688_v8 = vpop.f32.mrf.mxu1  ;;  %v1032_v15 = vpop.f32.mrf.mxu2  ;;  %1665 = vst.msk [vmem:[%s2627_s22 + $0x4] sm:$0xf] %vm1663_vm4, %v1600_v32 }
  0xd0   : > { %v1202_v20 = vadd.f32 %v2622_v29, %v1032_v15  ;;  %v1601_v29 = vpack.c.bf16 %v1537_v24, %v1537_v24  ;;  %v1538_v38 = vmax.f32 %v1474_v25, 0.0 }
  0xd1   : > { %v954_v21 = vpop.f32.mrf.mxu0 }
  0xd2   : > { %v1124_v28 = vadd.f32 %v2642_v33, %v954_v21  ;;  %v1633_v33 = vpack.c.bf16 %v1569_v34, %v1569_v34  ;;  %v1307_v45 = vadd.f32 %v1202_v20, %v373_v26  ;;  %1666 = vst.msk [vmem:[%s2627_s22 + $0x8] sm:$0xf] %vm1663_vm4, %v1601_v29  ;;  %v1602_v47 = vpack.c.bf16 %v1538_v38, %v1538_v38  ;;  %v1962_v20 = vld [vmem:[%s2377_s30 + $0xd8] sm:$0xf0]  ;;  %v2239_v21 = vld [vmem:[%s2377_s30 + $0x1d4] sm:$0xf] }
  0xd3   : > { %v1438_v40 = vld [vmem:[#allocation2 + $0x118] sm:$0xff]  ;;  %v2093_v25 = vor.u32 %v2239_v21, %v2090_v22  ;;  %v1952_v34 = vld [vmem:[%s2377_s30 + $0xc0] sm:$0xf] }
  0xd4   : > { %v1506_v43 = vadd.f32 %v2583_v9, %v1438_v40  ;;  %v1276_v49 = vadd.f32 %v1124_v28, %v342_v35  ;;  %1698 = vst.msk [vmem:[%s2627_s22 + $0x88] sm:$0xf] %vm1663_vm4, %v1633_v33  ;;  %v2206_v35 = vld [vmem:[%s2377_s30 + $0xc4] sm:$0xf0]  ;;  %v2080_v40 = vld [vmem:[%s2377_s30 + $0x1c0] sm:$0xf] }
  0xd5   : > { %v1407_v44 = vld [vmem:[#allocation2 + $0x20] sm:$0xff]  ;;  %1667 = vst.msk [vmem:[%s2627_s22 + $0xc] sm:$0xf] %vm1663_vm4, %v1602_v47  ;;  %v2734_v7 = vpop.f32.mrf.mxu3 }
  0xd6   : > { %v1475_v48 = vadd.f32 %v2583_v9, %v1407_v44  ;;  %v1570_v53 = vmax.f32 %v1506_v43, 0.0  ;;  %1372 = vst.msk [vmem:[#allocation2 + $0x120] sm:$0xff] %vm272_vm3, %v1307_v45  ;;  %v376_v43 = vld [vmem:[#allocation2 + $0x138] sm:$0xff]  ;;  %v1953_v45 = vor.u32 %v2206_v35, %v1952_v34 }
  0xd7   : > { %v2711_v50 = vpop.f32.mrf.mxu1  ;;  %v1034_v56 = vpop.f32.mrf.mxu2  ;;  %1341 = vst.msk [vmem:[#allocation2 + $0x28] sm:$0xff] %vm272_vm3, %v1276_v49  ;;  %v345_v49 = vld [vmem:[#allocation2 + $0x40] sm:$0xff] }
  0xd8   : > { %v1539_v54 = vmax.f32 %v1475_v48, 0.0  ;;  %v1634_v60 = vpack.c.bf16 %v1570_v53, %v1570_v53  ;;  %v1204_v61 = vadd.f32 %v2650_v39, %v1034_v56 }
  0xd9   : > { %v957_v63 = vpop.f32.mrf.mxu0 }
  0xda   : > { %2158 = vmatmul.msk.bf16.gmra.mxu1 %vm829_vm2, %v1957_v41  ;;  %v1603_v37 = vpack.c.bf16 %v1539_v54, %v1539_v54  ;;  %v1127_v2 = vadd.f32 %v2673_v58, %v957_v63  ;;  %1699 = vst.msk [vmem:[%s2627_s22 + $0x8c] sm:$0xf] %vm1663_vm4, %v1634_v60  ;;  %v1308_v3 = vadd.f32 %v1204_v61, %v374_v55  ;;  %v375_v58 = vld [vmem:[#allocation2 + $0x130] sm:$0xff]  ;;  %v2238_v41 = vld [vmem:[%s2377_s30 + $0x1c4] sm:$0xf0] }
  0xdb   : > { %2175 = vmatmul.msk.bf16.gmra.mxu3 %vm829_vm2, %v2093_v25  ;;  %v2081_v52 = vor.u32 %v2238_v41, %v2080_v40 }
  0xdc   : > { %1668 = vst.msk [vmem:[%s2627_s22 + $0x10] sm:$0xf] %vm1663_vm4, %v1603_v37  ;;  %v1277_v4 = vadd.f32 %v1127_v2, %v343_v62  ;;  %996 = vmatmul.bf16.gmra.mxu0 %v1945_v57  ;;  %1076 = vmatmul.bf16.gmra.mxu2 %v2073_v1  ;;  %v377_v1 = vld [vmem:[#allocation2 + $0x140] sm:$0xff] }
  0xdd   : > { %1373 = vst.msk [vmem:[#allocation2 + $0x128] sm:$0xff] %vm272_vm3, %v1308_v3  ;;  %v1439_v5 = vld [vmem:[#allocation2 + $0x120] sm:$0xff]  ;;  %v2759_v46 = vpop.f32.mrf.mxu3 }
  0xde   : > { %1342 = vst.msk [vmem:[#allocation2 + $0x30] sm:$0xff] %vm272_vm3, %v1277_v4  ;;  %v1507_v11 = vadd.f32 %v2583_v9, %v1439_v5  ;;  %v1408_v12 = vld [vmem:[#allocation2 + $0x28] sm:$0xff] }
  0xdf   : > { %v2732_v39 = vpop.f32.mrf.mxu1  ;;  %v1037_v6 = vpop.f32.mrf.mxu2  ;;  %v1476_v18 = vadd.f32 %v2583_v9, %v1408_v12  ;;  %v346_v5 = vld [vmem:[#allocation2 + $0x48] sm:$0xff] }
  0xe0   : > { %v1207_v13 = vadd.f32 %v2679_v0, %v1037_v6  ;;  %v1571_v23 = vmax.f32 %v1507_v11, 0.0  ;;  %v2209_v6 = vld [vmem:[%s2377_s30 + $0xe4] sm:$0xf] }
  0xe1   : > { %v959_v15 = vpop.f32.mrf.mxu0  ;;  %v1540_v26 = vmax.f32 %v1476_v18, 0.0 }
  0xe2   : > { %v1129_v19 = vadd.f32 %v2688_v8, %v959_v15  ;;  %v1309_v24 = vadd.f32 %v1207_v13, %v375_v58  ;;  %v1635_v30 = vpack.c.bf16 %v1571_v23, %v1571_v23  ;;  %v1965_v8 = vor.u32 %v2207_v17, %v1962_v20  ;;  %v1970_v13 = vld [vmem:[%s2377_s30 + $0xe8] sm:$0xf0]  ;;  %v2208_v23 = vld [vmem:[%s2377_s30 + $0xd4] sm:$0xf0] }
  0xe3   : > { %v1604_v36 = vpack.c.bf16 %v1540_v26, %v1540_v26  ;;  %v2098_v15 = vld [vmem:[%s2377_s30 + $0x1e8] sm:$0xf0]  ;;  %v1973_v22 = vor.u32 %v2209_v6, %v1970_v13  ;;  %v2088_v26 = vld [vmem:[%s2377_s30 + $0x1d0] sm:$0xf] }
  0xe4   : > { %v1440_v28 = vld [vmem:[#allocation2 + $0x128] sm:$0xff]  ;;  %v1278_v0 = vadd.f32 %v1129_v19, %v344_v14  ;;  %1374 = vst.msk [vmem:[#allocation2 + $0x130] sm:$0xff] %vm272_vm3, %v1309_v24  ;;  %v2241_v14 = vld [vmem:[%s2377_s30 + $0x1e4] sm:$0xf] }
  0xe5   : > { %v1508_v31 = vadd.f32 %v2583_v9, %v1440_v28  ;;  %v1409_v32 = vld [vmem:[#allocation2 + $0x30] sm:$0xff]  ;;  %1700 = vst.msk [vmem:[%s2627_s22 + $0x90] sm:$0xf] %vm1663_vm4, %v1635_v30  ;;  %v2774_v2 = vpop.f32.mrf.mxu3  ;;  %v2101_v18 = vor.u32 %v2241_v14, %v2098_v15  ;;  %v2240_v28 = vld [vmem:[%s2377_s30 + $0x1d4] sm:$0xf0] }
  0xe6   : > { %v1477_v29 = vadd.f32 %v2583_v9, %v1409_v32  ;;  %1343 = vst.msk [vmem:[#allocation2 + $0x38] sm:$0xff] %vm272_vm3, %v1278_v0  ;;  %v2089_v41 = vor.u32 %v2240_v28, %v2088_v26  ;;  %v2096_v15 = vld [vmem:[%s2377_s30 + $0x1e0] sm:$0xf] }
  0xe7   : > { %v2751_v38 = vpop.f32.mrf.mxu1  ;;  %v1572_v42 = vmax.f32 %v1508_v31, 0.0  ;;  %1669 = vst.msk [vmem:[%s2627_s22 + $0x14] sm:$0xf] %vm1663_vm4, %v1604_v36  ;;  %v1039_v44 = vpop.f32.mrf.mxu2  ;;  %v378_v31 = vld [vmem:[#allocation2 + $0x148] sm:$0xff] }
  0xe8   : > { %v1541_v33 = vmax.f32 %v1477_v29, 0.0  ;;  %v1209_v48 = vadd.f32 %v2692_v16, %v1039_v44  ;;  %v347_v29 = vld [vmem:[#allocation2 + $0x50] sm:$0xff] }
  0xe9   : > { %v1636_v47 = vpack.c.bf16 %v1572_v42, %v1572_v42  ;;  %v962_v51 = vpop.f32.mrf.mxu0 }
  0xea   : > { %2159 = vmatmul.msk.bf16.gmra.mxu1 %vm829_vm2, %v1965_v8  ;;  %v1605_v53 = vpack.c.bf16 %v1541_v33, %v1541_v33  ;;  %v1132_v54 = vadd.f32 %v2711_v50, %v962_v51  ;;  %v1310_v55 = vadd.f32 %v1209_v48, %v376_v43 }
  0xeb   : > { %1701 = vst.msk [vmem:[%s2627_s22 + $0x94] sm:$0xf] %vm1663_vm4, %v1636_v47  ;;  %v1441_v56 = vld [vmem:[#allocation2 + $0x130] sm:$0xff]  ;;  %2176 = vmatmul.msk.bf16.gmra.mxu3 %vm829_vm2, %v2101_v18 }
  0xec   : > { %1670 = vst.msk [vmem:[%s2627_s22 + $0x18] sm:$0xf] %vm1663_vm4, %v1605_v53  ;;  %v1279_v57 = vadd.f32 %v1132_v54, %v345_v49  ;;  %1001 = vmatmul.bf16.gmra.mxu0 %v1953_v45  ;;  %v1509_v60 = vadd.f32 %v2583_v9, %v1441_v56  ;;  %1081 = vmatmul.bf16.gmra.mxu2 %v2081_v52  ;;  %v379_v52 = vld [vmem:[#allocation2 + $0x150] sm:$0xff] }
  0xed   : > { %v1410_v16 = vld [vmem:[#allocation2 + $0x38] sm:$0xff]  ;;  %1375 = vst.msk [vmem:[#allocation2 + $0x138] sm:$0xff] %vm272_vm3, %v1310_v55  ;;  %v2797_v34 = vpop.f32.mrf.mxu3 }
  0xee   : > { %v1478_v61 = vadd.f32 %v2583_v9, %v1410_v16  ;;  %1344 = vst.msk [vmem:[#allocation2 + $0x40] sm:$0xff] %vm272_vm3, %v1279_v57  ;;  %v1573_v62 = vmax.f32 %v1509_v60, 0.0  ;;  %v348_v57 = vld [vmem:[#allocation2 + $0x58] sm:$0xff]  ;;  %v2211_v16 = vld [vmem:[%s2377_s30 + $0xf4] sm:$0xf] }
  0xef   : > { %v2772_v50 = vpop.f32.mrf.mxu1  ;;  %v1042_v37 = vpop.f32.mrf.mxu2 }
  0xf0   : > { %v1542_v63 = vmax.f32 %v1478_v61, 0.0  ;;  %v1637_v3 = vpack.c.bf16 %v1573_v62, %v1573_v62  ;;  %v1212_v4 = vadd.f32 %v2719_v59, %v1042_v37  ;;  %v2106_v37 = vld [vmem:[%s2377_s30 + $0x1f8] sm:$0xf0] }
  0xf1   : > { %v964_v58 = vpop.f32.mrf.mxu0 }
  0xf2   : > { %v1606_v11 = vpack.c.bf16 %v1542_v63, %v1542_v63  ;;  %v1134_v12 = vadd.f32 %v2732_v39, %v964_v58  ;;  %1702 = vst.msk [vmem:[%s2627_s22 + $0x98] sm:$0xf] %vm1663_vm4, %v1637_v3  ;;  %v1311_v17 = vadd.f32 %v1212_v4, %v377_v1  ;;  %v1960_v39 = vld [vmem:[%s2377_s30 + $0xd0] sm:$0xf]  ;;  %v1978_v63 = vld [vmem:[%s2377_s30 + $0xf8] sm:$0xf0] }
  0xf3   : > { %v1961_v8 = vor.u32 %v2208_v23, %v1960_v39  ;;  %v2243_v1 = vld [vmem:[%s2377_s30 + $0x1f4] sm:$0xf] }
  0xf4   : > { %1671 = vst.msk [vmem:[%s2627_s22 + $0x1c] sm:$0xf] %vm1663_vm4, %v1606_v11  ;;  %v1442_v59 = vld [vmem:[#allocation2 + $0x138] sm:$0xff]  ;;  %v1280_v19 = vadd.f32 %v1134_v12, %v346_v5  ;;  %v2109_v4 = vor.u32 %v2243_v1, %v2106_v37  ;;  %v1981_v11 = vor.u32 %v2211_v16, %v1978_v63  ;;  %v2210_v12 = vld [vmem:[%s2377_s30 + $0xe4] sm:$0xf0] }
  0xf5   : > { %v1510_v20 = vadd.f32 %v2583_v9, %v1442_v59  ;;  %v1411_v21 = vld [vmem:[#allocation2 + $0x40] sm:$0xff]  ;;  %1376 = vst.msk [vmem:[#allocation2 + $0x140] sm:$0xff] %vm272_vm3, %v1311_v17  ;;  %v2812_v54 = vpop.f32.mrf.mxu3  ;;  %v2242_v17 = vld [vmem:[%s2377_s30 + $0x1e4] sm:$0xf0]  ;;  %v2212_v16 = vld [vmem:[%s2377_s30 + $0xf4] sm:$0xf0] }
  0xf6   : > { %v1479_v24 = vadd.f32 %v2583_v9, %v1411_v21  ;;  %1345 = vst.msk [vmem:[#allocation2 + $0x48] sm:$0xff] %vm272_vm3, %v1280_v19  ;;  %v380_v19 = vld [vmem:[#allocation2 + $0x158] sm:$0xff]  ;;  %v2097_v28 = vor.u32 %v2242_v17, %v2096_v15 }
  0xf7   : > { %v2793_v25 = vpop.f32.mrf.mxu1  ;;  %v1574_v0 = vmax.f32 %v1510_v20, 0.0  ;;  %v1044_v32 = vpop.f32.mrf.mxu2  ;;  %v2244_v63 = vld [vmem:[%s2377_s30 + $0x1f4] sm:$0xf0] }
  0xf8   : > { %v1543_v30 = vmax.f32 %v1479_v24, 0.0  ;;  %v1214_v36 = vadd.f32 %v2734_v7, %v1044_v32  ;;  %v349_v24 = vld [vmem:[#allocation2 + $0x60] sm:$0xff] }
  0xf9   : > { %v1638_v35 = vpack.c.bf16 %v1574_v0, %v1574_v0  ;;  %v967_v40 = vpop.f32.mrf.mxu0 }
  0xfa   : > { %2160 = vmatmul.msk.bf16.gmra.mxu1 %vm829_vm2, %v1973_v22  ;;  %v1607_v42 = vpack.c.bf16 %v1543_v30, %v1543_v30  ;;  %v1137_v33 = vadd.f32 %v2751_v38, %v967_v40  ;;  %v1312_v43 = vadd.f32 %v1214_v36, %v378_v31 }
  0xfb   : > { %1703 = vst.msk [vmem:[%s2627_s22 + $0x9c] sm:$0xf] %vm1663_vm4, %v1638_v35  ;;  %2177 = vmatmul.msk.bf16.gmra.mxu3 %vm829_vm2, %v2109_v4 }
  0xfc   : > { %1672 = vst.msk [vmem:[%s2627_s22 + $0x20] sm:$0xf] %vm1663_vm4, %v1607_v42  ;;  %v1443_v44 = vld [vmem:[#allocation2 + $0x140] sm:$0xff]  ;;  %v1281_v45 = vadd.f32 %v1137_v33, %v347_v29  ;;  %1006 = vmatmul.bf16.gmra.mxu0 %v1961_v8  ;;  %1086 = vmatmul.bf16.gmra.mxu2 %v2089_v41 }
  0xfd   : > { %v1511_v47 = vadd.f32 %v2583_v9, %v1443_v44  ;;  %v1412_v7 = vld [vmem:[#allocation2 + $0x48] sm:$0xff]  ;;  %1377 = vst.msk [vmem:[#allocation2 + $0x148] sm:$0xff] %vm272_vm3, %v1312_v43  ;;  %v2835_v22 = vpop.f32.mrf.mxu3  ;;  %v381_v41 = vld [vmem:[#allocation2 + $0x160] sm:$0xff] }
  0xfe   : > { %v1480_v48 = vadd.f32 %v2583_v9, %v1412_v7  ;;  %1346 = vst.msk [vmem:[#allocation2 + $0x50] sm:$0xff] %vm272_vm3, %v1281_v45  ;;  %v350_v45 = vld [vmem:[#allocation2 + $0x68] sm:$0xff] }
  0xff   : > { %v2810_v38 = vpop.f32.mrf.mxu1  ;;  %v1575_v49 = vmax.f32 %v1511_v47, 0.0  ;;  %v1047_v53 = vpop.f32.mrf.mxu2 }
 0x100   : > { %v1544_v51 = vmax.f32 %v1480_v48, 0.0  ;;  %v1217_v56 = vadd.f32 %v2759_v46, %v1047_v53 }
 0x101   : > { %v1639_v55 = vpack.c.bf16 %v1575_v49, %v1575_v49  ;;  %v969_v60 = vpop.f32.mrf.mxu0  ;;  %v2213_v49 = vld [vmem:[%s2377_s30 + $0x104] sm:$0xf] }
 0x102   : > { %v1608_v61 = vpack.c.bf16 %v1544_v51, %v1544_v51  ;;  %v1139_v62 = vadd.f32 %v2772_v50, %v969_v60  ;;  %v1313_v3 = vadd.f32 %v1217_v56, %v379_v52  ;;  %v1968_v50 = vld [vmem:[%s2377_s30 + $0xe0] sm:$0xf]  ;;  %v1986_v51 = vld [vmem:[%s2377_s30 + $0x108] sm:$0xf0]  ;;  %v1976_v60 = vld [vmem:[%s2377_s30 + $0xf0] sm:$0xf] }
 0x103   : > { %1704 = vst.msk [vmem:[%s2627_s22 + $0xa0] sm:$0xf] %vm1663_vm4, %v1639_v55  ;;  %v1969_v21 = vor.u32 %v2210_v12, %v1968_v50 }
 0x104   : > { %1673 = vst.msk [vmem:[%s2627_s22 + $0x24] sm:$0xf] %vm1663_vm4, %v1608_v61  ;;  %v1444_v46 = vld [vmem:[#allocation2 + $0x148] sm:$0xff]  ;;  %v1282_v5 = vadd.f32 %v1139_v62, %v348_v57  ;;  %v1989_v57 = vor.u32 %v2213_v49, %v1986_v51  ;;  %v2104_v62 = vld [vmem:[%s2377_s30 + $0x1f0] sm:$0xf] }
 0x105   : > { %v1512_v58 = vadd.f32 %v2583_v9, %v1444_v46  ;;  %v1413_v6 = vld [vmem:[#allocation2 + $0x50] sm:$0xff]  ;;  %1378 = vst.msk [vmem:[#allocation2 + $0x150] sm:$0xff] %vm272_vm3, %v1313_v3  ;;  %v2850_v33 = vpop.f32.mrf.mxu3  ;;  %v382_v3 = vld [vmem:[#allocation2 + $0x168] sm:$0xff]  ;;  %v1977_v46 = vor.u32 %v2212_v16, %v1976_v60  ;;  %v2105_v12 = vor.u32 %v2244_v63, %v2104_v62 }
 0x106   : > { %v1481_v13 = vadd.f32 %v2583_v9, %v1413_v6  ;;  %1347 = vst.msk [vmem:[#allocation2 + $0x58] sm:$0xff] %vm272_vm3, %v1282_v5 }
 0x107   : > { %v2831_v14 = vpop.f32.mrf.mxu1  ;;  %v1576_v18 = vmax.f32 %v1512_v58, 0.0  ;;  %v1049_v20 = vpop.f32.mrf.mxu2 }
 0x108   : > { %v1545_v59 = vmax.f32 %v1481_v13, 0.0  ;;  %v1219_v23 = vadd.f32 %v2774_v2, %v1049_v20 }
 0x109   : > { %v1640_v39 = vpack.c.bf16 %v1576_v18, %v1576_v18  ;;  %v972_v26 = vpop.f32.mrf.mxu0 }
 0x10a   : > { %2161 = vmatmul.msk.bf16.gmra.mxu1 %vm829_vm2, %v1981_v11  ;;  %v1609_v0 = vpack.c.bf16 %v1545_v59, %v1545_v59  ;;  %v1142_v30 = vadd.f32 %v2793_v25, %v972_v26  ;;  %v1314_v31 = vadd.f32 %v1219_v23, %v380_v19  ;;  %v351_v11 = vld [vmem:[#allocation2 + $0x70] sm:$0xff] }
 0x10b   : > { %1705 = vst.msk [vmem:[%s2627_s22 + $0xa4] sm:$0xf] %vm1663_vm4, %v1640_v39  ;;  %v383_v23 = vld [vmem:[#allocation2 + $0x170] sm:$0xff] }
 0x10c   : > { %1674 = vst.msk [vmem:[%s2627_s22 + $0x28] sm:$0xf] %vm1663_vm4, %v1609_v0  ;;  %v1445_v32 = vld [vmem:[#allocation2 + $0x150] sm:$0xff]  ;;  %v1283_v8 = vadd.f32 %v1142_v30, %v349_v24  ;;  %1011 = vmatmul.bf16.gmra.mxu0 %v1969_v21  ;;  %1091 = vmatmul.bf16.gmra.mxu2 %v2097_v28  ;;  %v352_v30 = vld [vmem:[#allocation2 + $0x78] sm:$0xff] }
 0x10d   : > { %v1513_v35 = vadd.f32 %v2583_v9, %v1445_v32  ;;  %v1414_v36 = vld [vmem:[#allocation2 + $0x58] sm:$0xff]  ;;  %1379 = vst.msk [vmem:[#allocation2 + $0x158] sm:$0xff] %vm272_vm3, %v1314_v31  ;;  %v2868_v5 = vpop.f32.mrf.mxu3 }
 0x10e   : > { %v1482_v2 = vadd.f32 %v2583_v9, %v1414_v36  ;;  %1348 = vst.msk [vmem:[#allocation2 + $0x60] sm:$0xff] %vm272_vm3, %v1283_v8 }
 0x10f   : > { %v2848_v25 = vpop.f32.mrf.mxu1  ;;  %v1577_v29 = vmax.f32 %v1513_v35, 0.0  ;;  %v1052_v42 = vpop.f32.mrf.mxu2 }
 0x110   : > { %v1546_v40 = vmax.f32 %v1482_v2, 0.0  ;;  %v1222_v44 = vadd.f32 %v2797_v34, %v1052_v42 }
 0x111   : > { %v1641_v43 = vpack.c.bf16 %v1577_v29, %v1577_v29  ;;  %v974_v47 = vpop.f32.mrf.mxu0 }
 0x112   : > { %v1610_v7 = vpack.c.bf16 %v1546_v40, %v1546_v40  ;;  %v1144_v48 = vadd.f32 %v2810_v38, %v974_v47  ;;  %v1315_v52 = vadd.f32 %v1222_v44, %v381_v41 }
 0x113   : > { %1706 = vst.msk [vmem:[%s2627_s22 + $0xa8] sm:$0xf] %vm1663_vm4, %v1641_v43  ;;  %v384_v43 = vld [vmem:[#allocation2 + $0x178] sm:$0xff] }
 0x114   : > { %1675 = vst.msk [vmem:[%s2627_s22 + $0x2c] sm:$0xf] %vm1663_vm4, %v1610_v7  ;;  %v1446_v53 = vld [vmem:[#allocation2 + $0x158] sm:$0xff]  ;;  %v1284_v55 = vadd.f32 %v1144_v48, %v350_v45  ;;  %v353_v48 = vld [vmem:[#allocation2 + $0x80] sm:$0xff] }
 0x115   : > { %v1514_v34 = vadd.f32 %v2583_v9, %v1446_v53  ;;  %v1415_v56 = vld [vmem:[#allocation2 + $0x60] sm:$0xff]  ;;  %1380 = vst.msk [vmem:[#allocation2 + $0x160] sm:$0xff] %vm272_vm3, %v1315_v52  ;;  %v2881_v26 = vpop.f32.mrf.mxu3 }
 0x116   : > { %v1483_v38 = vadd.f32 %v2583_v9, %v1415_v56  ;;  %1349 = vst.msk [vmem:[#allocation2 + $0x68] sm:$0xff] %vm272_vm3, %v1284_v55 }
 0x117   : > { %v1151_v61 = vpop.f32.mrf.mxu1  ;;  %v1578_v1 = vmax.f32 %v1514_v34, 0.0  ;;  %v1054_v4 = vpop.f32.mrf.mxu2 }
 0x118   : > { %v1547_v37 = vmax.f32 %v1483_v38, 0.0  ;;  %v1224_v6 = vadd.f32 %v2812_v54, %v1054_v4 }
 0x119   : > { %v1642_v58 = vpack.c.bf16 %v1578_v1, %v1578_v1  ;;  %v977_v50 = vpop.f32.mrf.mxu0 }
 0x11a   : > { %2162 = vmatmul.msk.bf16.gmra.mxu1 %vm829_vm2, %v1989_v57  ;;  %v1611_v13 = vpack.c.bf16 %v1547_v37, %v1547_v37  ;;  %v1147_v15 = vadd.f32 %v2831_v14, %v977_v50  ;;  %v1316_v17 = vadd.f32 %v1224_v6, %v382_v3  ;;  %v354_v3 = vld [vmem:[#allocation2 + $0x88] sm:$0xff] }
 0x11b   : > { %1707 = vst.msk [vmem:[%s2627_s22 + $0xac] sm:$0xf] %vm1663_vm4, %v1642_v58 }
 0x11c   : > { %1676 = vst.msk [vmem:[%s2627_s22 + $0x30] sm:$0xf] %vm1663_vm4, %v1611_v13  ;;  %v1447_v18 = vld [vmem:[#allocation2 + $0x160] sm:$0xff]  ;;  %v1285_v59 = vadd.f32 %v1147_v15, %v351_v11  ;;  %1016 = vmatmul.bf16.gmra.mxu0 %v1977_v46  ;;  %1096 = vmatmul.bf16.gmra.mxu2 %v2105_v12 }
 0x11d   : > { %v1515_v19 = vadd.f32 %v2583_v9, %v1447_v18  ;;  %v1416_v20 = vld [vmem:[#allocation2 + $0x68] sm:$0xff]  ;;  %1381 = vst.msk [vmem:[#allocation2 + $0x168] sm:$0xff] %vm272_vm3, %v1316_v17  ;;  %v2893_v45 = vpop.f32.mrf.mxu3 }
 0x11e   : > { %v1484_v54 = vadd.f32 %v2583_v9, %v1416_v20  ;;  %1350 = vst.msk [vmem:[#allocation2 + $0x70] sm:$0xff] %vm272_vm3, %v1285_v59  ;;  %v386_v59 = vld [vmem:[#allocation2 + $0x188] sm:$0xff] }
 0x11f   : > { %v1153_v14 = vpop.f32.mrf.mxu1  ;;  %v1579_v21 = vmax.f32 %v1515_v19, 0.0  ;;  %v1057_v24 = vpop.f32.mrf.mxu2 }
 0x120   : > { %v1548_v39 = vmax.f32 %v1484_v54, 0.0  ;;  %v1227_v0 = vadd.f32 %v2835_v22, %v1057_v24 }
 0x121   : > { %v1643_v28 = vpack.c.bf16 %v1579_v21, %v1579_v21  ;;  %v979_v31 = vpop.f32.mrf.mxu0 }
 0x122   : > { %v1612_v32 = vpack.c.bf16 %v1548_v39, %v1548_v39  ;;  %v1149_v8 = vadd.f32 %v2848_v25, %v979_v31  ;;  %v1317_v35 = vadd.f32 %v1227_v0, %v383_v23 }
 0x123   : > { %1708 = vst.msk [vmem:[%s2627_s22 + $0xb0] sm:$0xf] %vm1663_vm4, %v1643_v28 }
 0x124   : > { %1677 = vst.msk [vmem:[%s2627_s22 + $0x34] sm:$0xf] %vm1663_vm4, %v1612_v32  ;;  %v1448_v36 = vld [vmem:[#allocation2 + $0x168] sm:$0xff]  ;;  %v1286_v2 = vadd.f32 %v1149_v8, %v352_v30 }
 0x125   : > { %v1516_v29 = vadd.f32 %v2583_v9, %v1448_v36  ;;  %v1417_v40 = vld [vmem:[#allocation2 + $0x70] sm:$0xff]  ;;  %1382 = vst.msk [vmem:[#allocation2 + $0x170] sm:$0xff] %vm272_vm3, %v1317_v35  ;;  %v2904_v63 = vpop.f32.mrf.mxu3 }
 0x126   : > { %v1485_v22 = vadd.f32 %v2583_v9, %v1417_v40  ;;  %1351 = vst.msk [vmem:[#allocation2 + $0x78] sm:$0xff] %vm272_vm3, %v1286_v2  ;;  %v387_v2 = vld [vmem:[#allocation2 + $0x190] sm:$0xff] }
 0x127   : > { %v1156_v41 = vpop.f32.mrf.mxu1  ;;  %v1580_v25 = vmax.f32 %v1516_v29, 0.0  ;;  %v1059_v44 = vpop.f32.mrf.mxu2 }
 0x128   : > { %v1549_v42 = vmax.f32 %v1485_v22, 0.0  ;;  %v1229_v7 = vadd.f32 %v2850_v33, %v1059_v44 }
 0x129   : > { %v1644_v47 = vpack.c.bf16 %v1580_v25, %v1580_v25  ;;  %v982_v49 = vpop.f32.mrf.mxu0 }
 0x12a   : > { %v1613_v51 = vpack.c.bf16 %v1549_v42, %v1549_v42  ;;  %v1152_v52 = vadd.f32 %v1151_v61, %v982_v49  ;;  %v1318_v53 = vadd.f32 %v1229_v7, %v384_v43  ;;  %v385_v61 = vld [vmem:[#allocation2 + $0x180] sm:$0xff] }
 0x12b   : > { %1709 = vst.msk [vmem:[%s2627_s22 + $0xb4] sm:$0xf] %vm1663_vm4, %v1644_v47 }
 0x12c   : > { %1678 = vst.msk [vmem:[%s2627_s22 + $0x38] sm:$0xf] %vm1663_vm4, %v1613_v51  ;;  %v1449_v55 = vld [vmem:[#allocation2 + $0x170] sm:$0xff]  ;;  %v1287_v34 = vadd.f32 %v1152_v52, %v353_v48  ;;  %v2932_v48 = vld [vmem:[%s3070_s2] ss:$0 sm:$0xff] }
 0x12d   : > { %v1517_v56 = vadd.f32 %v2583_v9, %v1449_v55  ;;  %v1418_v57 = vld [vmem:[#allocation2 + $0x78] sm:$0xff]  ;;  %1383 = vst.msk [vmem:[#allocation2 + $0x178] sm:$0xff] %vm272_vm3, %v1318_v53  ;;  %v1241_v24 = vpop.f32.mrf.mxu3 }
 0x12e   : > { %v1486_v60 = vadd.f32 %v2583_v9, %v1418_v57  ;;  %1352 = vst.msk [vmem:[#allocation2 + $0x80] sm:$0xff] %vm272_vm3, %v1287_v34  ;;  %v388_v34 = vld [vmem:[#allocation2 + $0x198] sm:$0xff] }
 0x12f   : > { %v1158_v33 = vpop.f32.mrf.mxu1  ;;  %v1581_v16 = vmax.f32 %v1517_v56, 0.0  ;;  %v1062_v62 = vpop.f32.mrf.mxu2 }
 0x130   : > { %v1550_v38 = vmax.f32 %v1486_v60, 0.0  ;;  %v1232_v37 = vadd.f32 %v2868_v5, %v1062_v62 }
 0x131   : > { %v1645_v1 = vpack.c.bf16 %v1581_v16, %v1581_v16  ;;  %v984_v4 = vpop.f32.mrf.mxu0 }
 0x132   : > { %v1614_v46 = vpack.c.bf16 %v1550_v38, %v1550_v38  ;;  %v1154_v58 = vadd.f32 %v1153_v14, %v984_v4  ;;  %v1319_v6 = vadd.f32 %v1232_v37, %v385_v61  ;;  %v355_v14 = vld [vmem:[#allocation2 + $0x90] sm:$0xff] }
 0x133   : > { %1710 = vst.msk [vmem:[%s2627_s22 + $0xb8] sm:$0xf] %vm1663_vm4, %v1645_v1 }
 0x134   : > { %1679 = vst.msk [vmem:[%s2627_s22 + $0x3c] sm:$0xf] %vm1663_vm4, %v1614_v46  ;;  %v1450_v11 = vld [vmem:[#allocation2 + $0x178] sm:$0xff]  ;;  %v1288_v50 = vadd.f32 %v1154_v58, %v354_v3 }
 0x135   : > { %v1518_v12 = vadd.f32 %v2583_v9, %v1450_v11  ;;  %v1419_v13 = vld [vmem:[#allocation2 + $0x80] sm:$0xff]  ;;  %1384 = vst.msk [vmem:[#allocation2 + $0x180] sm:$0xff] %vm272_vm3, %v1319_v6  ;;  %v1243_v7 = vpop.f32.mrf.mxu3 }
 0x136   : > { %v1487_v15 = vadd.f32 %v2583_v9, %v1419_v13  ;;  %1353 = vst.msk [vmem:[#allocation2 + $0x88] sm:$0xff] %vm272_vm3, %v1288_v50  ;;  %v389_v50 = vld [vmem:[#allocation2 + $0x1a0] sm:$0xff] }
 0x137   : > { %v1161_v5 = vpop.f32.mrf.mxu1  ;;  %v1582_v17 = vmax.f32 %v1518_v12, 0.0  ;;  %v1064_v19 = vpop.f32.mrf.mxu2 }
 0x138   : > { %v1551_v18 = vmax.f32 %v1487_v15, 0.0  ;;  %v1234_v54 = vadd.f32 %v2881_v26, %v1064_v19 }
 0x139   : > { %v1646_v20 = vpack.c.bf16 %v1582_v17, %v1582_v17  ;;  %v987_v21 = vpop.f32.mrf.mxu0 }
 0x13a   : > { %v1615_v39 = vpack.c.bf16 %v1551_v18, %v1551_v18  ;;  %v1157_v23 = vadd.f32 %v1156_v41, %v987_v21  ;;  %v1320_v28 = vadd.f32 %v1234_v54, %v386_v59  ;;  %v356_v41 = vld [vmem:[#allocation2 + $0x98] sm:$0xff] }
 0x13b   : > { %1711 = vst.msk [vmem:[%s2627_s22 + $0xbc] sm:$0xf] %vm1663_vm4, %v1646_v20 }
 0x13c   : > { %1680 = vst.msk [vmem:[%s2627_s22 + $0x40] sm:$0xf] %vm1663_vm4, %v1615_v39  ;;  %v1451_v0 = vld [vmem:[#allocation2 + $0x180] sm:$0xff]  ;;  %v1289_v30 = vadd.f32 %v1157_v23, %v355_v14 }
 0x13d   : > { %v1519_v31 = vadd.f32 %v2583_v9, %v1451_v0  ;;  %v1420_v32 = vld [vmem:[#allocation2 + $0x88] sm:$0xff]  ;;  %1385 = vst.msk [vmem:[#allocation2 + $0x188] sm:$0xff] %vm272_vm3, %v1320_v28  ;;  %v1246_v58 = vpop.f32.mrf.mxu3 }
 0x13e   : > { %v1488_v26 = vadd.f32 %v2583_v9, %v1420_v32  ;;  %1354 = vst.msk [vmem:[#allocation2 + $0x90] sm:$0xff] %vm272_vm3, %v1289_v30  ;;  %v390_v0 = vld [vmem:[#allocation2 + $0x1a8] sm:$0xff] }
 0x13f   : > { %v1163_v8 = vpop.f32.mrf.mxu1  ;;  %v1583_v35 = vmax.f32 %v1519_v31, 0.0  ;;  %v1067_v29 = vpop.f32.mrf.mxu2 }
 0x140   : > { %v1552_v36 = vmax.f32 %v1488_v26, 0.0  ;;  %v1237_v22 = vadd.f32 %v2893_v45, %v1067_v29 }
 0x141   : > { %v1647_v40 = vpack.c.bf16 %v1583_v35, %v1583_v35  ;;  %v989_v25 = vpop.f32.mrf.mxu0 }
 0x142   : > { %v1616_v42 = vpack.c.bf16 %v1552_v36, %v1552_v36  ;;  %v1159_v43 = vadd.f32 %v1158_v33, %v989_v25  ;;  %v1321_v44 = vadd.f32 %v1237_v22, %v387_v2  ;;  %v357_v33 = vld [vmem:[#allocation2 + $0xa0] sm:$0xff] }
 0x143   : > { %1712 = vst.msk [vmem:[%s2627_s22 + $0xc0] sm:$0xf] %vm1663_vm4, %v1647_v40 }
 0x144   : > { %1681 = vst.msk [vmem:[%s2627_s22 + $0x44] sm:$0xf] %vm1663_vm4, %v1616_v42  ;;  %v1452_v9 = vld [vmem:[#allocation2 + $0x188] sm:$0xff]  ;;  %v1290_v47 = vadd.f32 %v1159_v43, %v356_v41 }
 0x145   : > { %v1520_v49 = vadd.f32 %v2932_v48, %v1452_v9  ;;  %v1421_v45 = vld [vmem:[#allocation2 + $0x90] sm:$0xff]  ;;  %1386 = vst.msk [vmem:[#allocation2 + $0x190] sm:$0xff] %vm272_vm3, %v1321_v44  ;;  %v1248_v31 = vpop.f32.mrf.mxu3 }
 0x146   : > { %v1489_v51 = vadd.f32 %v2932_v48, %v1421_v45  ;;  %1355 = vst.msk [vmem:[#allocation2 + $0x98] sm:$0xff] %vm272_vm3, %v1290_v47  ;;  %v391_v47 = vld [vmem:[#allocation2 + $0x1b0] sm:$0xff] }
 0x147   : > { %v1166_v52 = vpop.f32.mrf.mxu1  ;;  %v1584_v53 = vmax.f32 %v1520_v49, 0.0  ;;  %v1069_v56 = vpop.f32.mrf.mxu2 }
 0x148   : > { %v1553_v55 = vmax.f32 %v1489_v51, 0.0  ;;  %v1239_v60 = vadd.f32 %v2904_v63, %v1069_v56  ;;  %v360_v51 = vld [vmem:[#allocation2 + $0xb8] sm:$0xff] }
 0x149   : > { %v1648_v57 = vpack.c.bf16 %v1584_v53, %v1584_v53  ;;  %v992_v16 = vpop.f32.mrf.mxu0 }
 0x14a   : > { %v1617_v38 = vpack.c.bf16 %v1553_v55, %v1553_v55  ;;  %v1162_v61 = vadd.f32 %v1161_v5, %v992_v16  ;;  %v1322_v62 = vadd.f32 %v1239_v60, %v388_v34  ;;  %v358_v5 = vld [vmem:[#allocation2 + $0xa8] sm:$0xff] }
 0x14b   : > { %1713 = vst.msk [vmem:[%s2627_s22 + $0xc4] sm:$0xf] %vm1663_vm4, %v1648_v57 }
 0x14c   : > { %1682 = vst.msk [vmem:[%s2627_s22 + $0x48] sm:$0xf] %vm1663_vm4, %v1617_v38  ;;  %v1453_v1 = vld [vmem:[#allocation2 + $0x190] sm:$0xff]  ;;  %v1291_v37 = vadd.f32 %v1162_v61, %v357_v33 }
 0x14d   : > { %v1521_v3 = vadd.f32 %v2932_v48, %v1453_v1  ;;  %v1422_v4 = vld [vmem:[#allocation2 + $0x98] sm:$0xff]  ;;  %1387 = vst.msk [vmem:[#allocation2 + $0x198] sm:$0xff] %vm272_vm3, %v1322_v62  ;;  %v1251_v34 = vpop.f32.mrf.mxu3 }
 0x14e   : > { %v1490_v46 = vadd.f32 %v2932_v48, %v1422_v4  ;;  %1356 = vst.msk [vmem:[#allocation2 + $0xa0] sm:$0xff] %vm272_vm3, %v1291_v37  ;;  %v392_v37 = vld [vmem:[#allocation2 + $0x1b8] sm:$0xff] }
 0x14f   : > { %v1168_v63 = vpop.f32.mrf.mxu1  ;;  %v1585_v6 = vmax.f32 %v1521_v3, 0.0  ;;  %v1072_v12 = vpop.f32.mrf.mxu2 }
 0x150   : > { %v1554_v11 = vmax.f32 %v1490_v46, 0.0  ;;  %v1242_v15 = vadd.f32 %v1241_v24, %v1072_v12 }
 0x151   : > { %v1649_v13 = vpack.c.bf16 %v1585_v6, %v1585_v6  ;;  %v994_v17 = vpop.f32.mrf.mxu0 }
 0x152   : > { %v1618_v18 = vpack.c.bf16 %v1554_v11, %v1554_v11  ;;  %v1164_v59 = vadd.f32 %v1163_v8, %v994_v17  ;;  %v1323_v19 = vadd.f32 %v1242_v15, %v389_v50  ;;  %v359_v8 = vld [vmem:[#allocation2 + $0xb0] sm:$0xff] }
 0x153   : > { %1714 = vst.msk [vmem:[%s2627_s22 + $0xc8] sm:$0xf] %vm1663_vm4, %v1649_v13 }
 0x154   : > { %1683 = vst.msk [vmem:[%s2627_s22 + $0x4c] sm:$0xf] %vm1663_vm4, %v1618_v18  ;;  %v1454_v20 = vld [vmem:[#allocation2 + $0x198] sm:$0xff]  ;;  %v1292_v54 = vadd.f32 %v1164_v59, %v358_v5 }
 0x155   : > { %v1522_v14 = vadd.f32 %v2932_v48, %v1454_v20  ;;  %v1423_v21 = vld [vmem:[#allocation2 + $0xa0] sm:$0xff]  ;;  %1388 = vst.msk [vmem:[#allocation2 + $0x1a0] sm:$0xff] %vm272_vm3, %v1323_v19  ;;  %v1253_v15 = vpop.f32.mrf.mxu3 }
 0x156   : > { %v1491_v39 = vadd.f32 %v2932_v48, %v1423_v21  ;;  %1357 = vst.msk [vmem:[#allocation2 + $0xa8] sm:$0xff] %vm272_vm3, %v1292_v54  ;;  %v393_v54 = vld [vmem:[#allocation2 + $0x1c0] sm:$0xff] }
 0x157   : > { %v1171_v23 = vpop.f32.mrf.mxu1  ;;  %v1586_v24 = vmax.f32 %v1522_v14, 0.0  ;;  %v1074_v30 = vpop.f32.mrf.mxu2 }
 0x158   : > { %v1555_v28 = vmax.f32 %v1491_v39, 0.0  ;;  %v1244_v26 = vadd.f32 %v1243_v7, %v1074_v30 }
 0x159   : > { %v1650_v32 = vpack.c.bf16 %v1586_v24, %v1586_v24  ;;  %v997_v35 = vpop.f32.mrf.mxu0 }
 0x15a   : > { %v1619_v36 = vpack.c.bf16 %v1555_v28, %v1555_v28  ;;  %v1167_v2 = vadd.f32 %v1166_v52, %v997_v35  ;;  %v1324_v29 = vadd.f32 %v1244_v26, %v390_v0 }
 0x15b   : > { %1715 = vst.msk [vmem:[%s2627_s22 + $0xcc] sm:$0xf] %vm1663_vm4, %v1650_v32 }
 0x15c   : > { %1684 = vst.msk [vmem:[%s2627_s22 + $0x50] sm:$0xf] %vm1663_vm4, %v1619_v36  ;;  %v1455_v40 = vld [vmem:[#allocation2 + $0x1a0] sm:$0xff]  ;;  %v1293_v22 = vadd.f32 %v1167_v2, %v359_v8 }
 0x15d   : > { %v1523_v41 = vadd.f32 %v2932_v48, %v1455_v40  ;;  %v1424_v25 = vld [vmem:[#allocation2 + $0xa8] sm:$0xff]  ;;  %1389 = vst.msk [vmem:[#allocation2 + $0x1a8] sm:$0xff] %vm272_vm3, %v1324_v29 }
 0x15e   : > { %v1492_v42 = vadd.f32 %v2932_v48, %v1424_v25  ;;  %1358 = vst.msk [vmem:[#allocation2 + $0xb0] sm:$0xff] %vm272_vm3, %v1293_v22  ;;  %v1256_v2 = vpop.f32.mrf.mxu3  ;;  %v394_v22 = vld [vmem:[#allocation2 + $0x1c8] sm:$0xff] }
 0x15f   : > { %v1173_v43 = vpop.f32.mrf.mxu1  ;;  %v1587_v44 = vmax.f32 %v1523_v41, 0.0  ;;  %v1077_v7 = vpop.f32.mrf.mxu2 }
 0x160   : > { %v1556_v9 = vmax.f32 %v1492_v42, 0.0  ;;  %v1247_v45 = vadd.f32 %v1246_v58, %v1077_v7 }
 0x161   : > { %v1651_v49 = vpack.c.bf16 %v1587_v44, %v1587_v44  ;;  %v999_v52 = vpop.f32.mrf.mxu0 }
 0x162   : > { %v1620_v53 = vpack.c.bf16 %v1556_v9, %v1556_v9  ;;  %v1169_v55 = vadd.f32 %v1168_v63, %v999_v52  ;;  %v1325_v56 = vadd.f32 %v1247_v45, %v391_v47  ;;  %v361_v63 = vld [vmem:[#allocation2 + $0xc0] sm:$0xff] }
 0x163   : > { %1716 = vst.msk [vmem:[%s2627_s22 + $0xd0] sm:$0xf] %vm1663_vm4, %v1651_v49 }
 0x164   : > { %1685 = vst.msk [vmem:[%s2627_s22 + $0x54] sm:$0xf] %vm1663_vm4, %v1620_v53  ;;  %v1456_v57 = vld [vmem:[#allocation2 + $0x1a8] sm:$0xff]  ;;  %v1294_v60 = vadd.f32 %v1169_v55, %v360_v51 }
 0x165   : > { %v1524_v33 = vadd.f32 %v2932_v48, %v1456_v57  ;;  %v1425_v16 = vld [vmem:[#allocation2 + $0xb0] sm:$0xff]  ;;  %1390 = vst.msk [vmem:[#allocation2 + $0x1b0] sm:$0xff] %vm272_vm3, %v1325_v56 }
 0x166   : > { %v1493_v38 = vadd.f32 %v2932_v48, %v1425_v16  ;;  %1359 = vst.msk [vmem:[#allocation2 + $0xb8] sm:$0xff] %vm272_vm3, %v1294_v60  ;;  %v395_v57 = vld [vmem:[#allocation2 + $0x1d0] sm:$0xff] }
 0x167   : > { %v1176_v61 = vpop.f32.mrf.mxu1  ;;  %v1588_v62 = vmax.f32 %v1524_v33, 0.0  ;;  %v1079_v3 = vpop.f32.mrf.mxu2 }
 0x168   : > { %v1557_v1 = vmax.f32 %v1493_v38, 0.0  ;;  %v1249_v46 = vadd.f32 %v1248_v31, %v1079_v3  ;;  %v1258_v33 = vpop.f32.mrf.mxu3 }
 0x169   : > { %v1652_v4 = vpack.c.bf16 %v1588_v62, %v1588_v62  ;;  %v1002_v58 = vpop.f32.mrf.mxu0 }
 0x16a   : > { %v1621_v6 = vpack.c.bf16 %v1557_v1, %v1557_v1  ;;  %v1172_v11 = vadd.f32 %v1171_v23, %v1002_v58  ;;  %v1326_v50 = vadd.f32 %v1249_v46, %v392_v37  ;;  %v362_v23 = vld [vmem:[#allocation2 + $0xc8] sm:$0xff] }
 0x16b   : > { %1717 = vst.msk [vmem:[%s2627_s22 + $0xd4] sm:$0xf] %vm1663_vm4, %v1652_v4 }
 0x16c   : > { %1686 = vst.msk [vmem:[%s2627_s22 + $0x58] sm:$0xf] %vm1663_vm4, %v1621_v6  ;;  %v1457_v12 = vld [vmem:[#allocation2 + $0x1b0] sm:$0xff]  ;;  %v1295_v13 = vadd.f32 %v1172_v11, %v361_v63 }
 0x16d   : > { %v1525_v5 = vadd.f32 %v2932_v48, %v1457_v12  ;;  %v1426_v17 = vld [vmem:[#allocation2 + $0xb8] sm:$0xff]  ;;  %1391 = vst.msk [vmem:[#allocation2 + $0x1b8] sm:$0xff] %vm272_vm3, %v1326_v50 }
 0x16e   : > { %v1494_v18 = vadd.f32 %v2932_v48, %v1426_v17  ;;  %1360 = vst.msk [vmem:[#allocation2 + $0xc0] sm:$0xff] %vm272_vm3, %v1295_v13  ;;  %v396_v13 = vld [vmem:[#allocation2 + $0x1d8] sm:$0xff] }
 0x16f   : > { %v1178_v59 = vpop.f32.mrf.mxu1  ;;  %v1589_v19 = vmax.f32 %v1525_v5, 0.0  ;;  %v1082_v14 = vpop.f32.mrf.mxu2 }
 0x170   : > { %v1558_v20 = vmax.f32 %v1494_v18, 0.0  ;;  %v1252_v39 = vadd.f32 %v1251_v34, %v1082_v14  ;;  %v365_v18 = vld [vmem:[#allocation2 + $0xe0] sm:$0xff] }
 0x171   : > { %v1653_v21 = vpack.c.bf16 %v1589_v19, %v1589_v19  ;;  %v1004_v24 = vpop.f32.mrf.mxu0 }
 0x172   : > { %v1622_v28 = vpack.c.bf16 %v1558_v20, %v1558_v20  ;;  %v1174_v0 = vadd.f32 %v1173_v43, %v1004_v24  ;;  %v1327_v30 = vadd.f32 %v1252_v39, %v393_v54  ;;  %v363_v43 = vld [vmem:[#allocation2 + $0xd0] sm:$0xff]  ;;  %v1261_v20 = vpop.f32.mrf.mxu3 }
 0x173   : > { %1718 = vst.msk [vmem:[%s2627_s22 + $0xd8] sm:$0xf] %vm1663_vm4, %v1653_v21 }
 0x174   : > { %1687 = vst.msk [vmem:[%s2627_s22 + $0x5c] sm:$0xf] %vm1663_vm4, %v1622_v28  ;;  %v1458_v31 = vld [vmem:[#allocation2 + $0x1b8] sm:$0xff]  ;;  %v1296_v32 = vadd.f32 %v1174_v0, %v362_v23 }
 0x175   : > { %v1526_v26 = vadd.f32 %v2932_v48, %v1458_v31  ;;  %v1427_v8 = vld [vmem:[#allocation2 + $0xc0] sm:$0xff]  ;;  %1392 = vst.msk [vmem:[#allocation2 + $0x1c0] sm:$0xff] %vm272_vm3, %v1327_v30 }
 0x176   : > { %v1495_v35 = vadd.f32 %v2932_v48, %v1427_v8  ;;  %1361 = vst.msk [vmem:[#allocation2 + $0xc8] sm:$0xff] %vm272_vm3, %v1296_v32  ;;  %v397_v32 = vld [vmem:[#allocation2 + $0x1e0] sm:$0xff] }
 0x177   : > { %v1181_v36 = vpop.f32.mrf.mxu1  ;;  %v1590_v29 = vmax.f32 %v1526_v26, 0.0  ;;  %v1084_v41 = vpop.f32.mrf.mxu2 }
 0x178   : > { %v1559_v40 = vmax.f32 %v1495_v35, 0.0  ;;  %v1254_v42 = vadd.f32 %v1253_v15, %v1084_v41 }
 0x179   : > { %v1654_v25 = vpack.c.bf16 %v1590_v29, %v1590_v29  ;;  %v1007_v44 = vpop.f32.mrf.mxu0 }
 0x17a   : > { %v1623_v9 = vpack.c.bf16 %v1559_v40, %v1559_v40  ;;  %v1177_v47 = vadd.f32 %v1176_v61, %v1007_v44  ;;  %v1328_v7 = vadd.f32 %v1254_v42, %v394_v22  ;;  %v364_v61 = vld [vmem:[#allocation2 + $0xd8] sm:$0xff] }
 0x17b   : > { %1719 = vst.msk [vmem:[%s2627_s22 + $0xdc] sm:$0xf] %vm1663_vm4, %v1654_v25  ;;  %v1263_v25 = vpop.f32.mrf.mxu3 }
 0x17c   : > { %1688 = vst.msk [vmem:[%s2627_s22 + $0x60] sm:$0xf] %vm1663_vm4, %v1623_v9  ;;  %v1459_v49 = vld [vmem:[#allocation2 + $0x1c0] sm:$0xff]  ;;  %v1297_v45 = vadd.f32 %v1177_v47, %v363_v43 }
 0x17d   : > { %v1527_v51 = vadd.f32 %v2932_v48, %v1459_v49  ;;  %v1428_v52 = vld [vmem:[#allocation2 + $0xc8] sm:$0xff]  ;;  %1393 = vst.msk [vmem:[#allocation2 + $0x1c8] sm:$0xff] %vm272_vm3, %v1328_v7  ;;  %v369_v47 = vld [vmem:[#allocation2 + $0x100] sm:$0xff] }
 0x17e   : > { %v1496_v53 = vadd.f32 %v2932_v48, %v1428_v52  ;;  %1362 = vst.msk [vmem:[#allocation2 + $0xd0] sm:$0xff] %vm272_vm3, %v1297_v45  ;;  %v398_v52 = vld [vmem:[#allocation2 + $0x1e8] sm:$0xff] }
 0x17f   : > { %v1183_v55 = vpop.f32.mrf.mxu1  ;;  %v1591_v34 = vmax.f32 %v1527_v51, 0.0  ;;  %v1087_v60 = vpop.f32.mrf.mxu2 }
 0x180   : > { %v1560_v56 = vmax.f32 %v1496_v53, 0.0  ;;  %v1257_v38 = vadd.f32 %v1256_v2, %v1087_v60 }
 0x181   : > { %v1655_v16 = vpack.c.bf16 %v1591_v34, %v1591_v34  ;;  %v1009_v62 = vpop.f32.mrf.mxu0 }
 0x182   : > { %v1624_v1 = vpack.c.bf16 %v1560_v56, %v1560_v56  ;;  %v1179_v37 = vadd.f32 %v1178_v59, %v1009_v62  ;;  %v1329_v3 = vadd.f32 %v1257_v38, %v395_v57  ;;  %v367_v57 = vld [vmem:[#allocation2 + $0xf0] sm:$0xff] }
 0x183   : > { %1720 = vst.msk [vmem:[%s2627_s22 + $0xe0] sm:$0xf] %vm1663_vm4, %v1655_v16 }
 0x184   : > { %1689 = vst.msk [vmem:[%s2627_s22 + $0x64] sm:$0xf] %vm1663_vm4, %v1624_v1  ;;  %v1460_v4 = vld [vmem:[#allocation2 + $0x1c8] sm:$0xff]  ;;  %v1298_v46 = vadd.f32 %v1179_v37, %v364_v61 }
 0x185   : > { %v1528_v63 = vadd.f32 %v2932_v48, %v1460_v4  ;;  %v1429_v58 = vld [vmem:[#allocation2 + $0xd0] sm:$0xff]  ;;  %1394 = vst.msk [vmem:[#allocation2 + $0x1d0] sm:$0xff] %vm272_vm3, %v1329_v3  ;;  %v1266_v3 = vpop.f32.mrf.mxu3  ;;  %v370_v4 = vld [vmem:[#allocation2 + $0x108] sm:$0xff] }
 0x186   : > { %v1497_v6 = vadd.f32 %v2932_v48, %v1429_v58  ;;  %1363 = vst.msk [vmem:[#allocation2 + $0xd8] sm:$0xff] %vm272_vm3, %v1298_v46 }
 0x187   : > { %v1186_v11 = vpop.f32.mrf.mxu1  ;;  %v1592_v50 = vmax.f32 %v1528_v63, 0.0  ;;  %v1089_v15 = vpop.f32.mrf.mxu2 }
 0x188   : > { %v1561_v12 = vmax.f32 %v1497_v6, 0.0  ;;  %v1259_v17 = vadd.f32 %v1258_v33, %v1089_v15 }
 0x189   : > { %v1656_v5 = vpack.c.bf16 %v1592_v50, %v1592_v50  ;;  %v1012_v59 = vpop.f32.mrf.mxu0 }
 0x18a   : > { %v1625_v19 = vpack.c.bf16 %v1561_v12, %v1561_v12  ;;  %v1182_v54 = vadd.f32 %v1181_v36, %v1012_v59  ;;  %v1330_v14 = vadd.f32 %v1259_v17, %v396_v13  ;;  %v366_v36 = vld [vmem:[#allocation2 + $0xe8] sm:$0xff] }
 0x18b   : > { %1721 = vst.msk [vmem:[%s2627_s22 + $0xe4] sm:$0xf] %vm1663_vm4, %v1656_v5  ;;  %v368_v5 = vld [vmem:[#allocation2 + $0xf8] sm:$0xff] }
 0x18c   : > { %1690 = vst.msk [vmem:[%s2627_s22 + $0x68] sm:$0xf] %vm1663_vm4, %v1625_v19  ;;  %v1461_v21 = vld [vmem:[#allocation2 + $0x1d0] sm:$0xff]  ;;  %v1299_v39 = vadd.f32 %v1182_v54, %v365_v18 }
 0x18d   : > { %v1529_v23 = vadd.f32 %v2932_v48, %v1461_v21  ;;  %v1430_v24 = vld [vmem:[#allocation2 + $0xd8] sm:$0xff]  ;;  %1395 = vst.msk [vmem:[#allocation2 + $0x1d8] sm:$0xff] %vm272_vm3, %v1330_v14 }
 0x18e   : > { %v1498_v28 = vadd.f32 %v2932_v48, %v1430_v24  ;;  %1364 = vst.msk [vmem:[#allocation2 + $0xe0] sm:$0xff] %vm272_vm3, %v1299_v39 }
 0x18f   : > { %v1188_v0 = vpop.f32.mrf.mxu1  ;;  %v1593_v30 = vmax.f32 %v1529_v23, 0.0  ;;  %v1092_v26 = vpop.f32.mrf.mxu2 }
 0x190   : > { %v1562_v31 = vmax.f32 %v1498_v28, 0.0  ;;  %v1262_v35 = vadd.f32 %v1261_v20, %v1092_v26 }
 0x191   : > { %v1657_v8 = vpack.c.bf16 %v1593_v30, %v1593_v30  ;;  %v1014_v2 = vpop.f32.mrf.mxu0  ;;  %v400_v30 = vld [vmem:[#allocation2 + $0x1f8] sm:$0xff] }
 0x192   : > { %v1626_v29 = vpack.c.bf16 %v1562_v31, %v1562_v31  ;;  %v1184_v40 = vadd.f32 %v1183_v55, %v1014_v2  ;;  %v1331_v22 = vadd.f32 %v1262_v35, %v397_v32 }
 0x193   : > { %1722 = vst.msk [vmem:[%s2627_s22 + $0xe8] sm:$0xf] %vm1663_vm4, %v1657_v8 }
 0x194   : > { %1691 = vst.msk [vmem:[%s2627_s22 + $0x6c] sm:$0xf] %vm1663_vm4, %v1626_v29  ;;  %v1462_v41 = vld [vmem:[#allocation2 + $0x1d8] sm:$0xff]  ;;  %v1300_v42 = vadd.f32 %v1184_v40, %v366_v36 }
 0x195   : > { %v1530_v43 = vadd.f32 %v2932_v48, %v1462_v41  ;;  %v1431_v44 = vld [vmem:[#allocation2 + $0xe0] sm:$0xff]  ;;  %1396 = vst.msk [vmem:[#allocation2 + $0x1e0] sm:$0xff] %vm272_vm3, %v1331_v22 }
 0x196   : > { %v1499_v9 = vadd.f32 %v2932_v48, %v1431_v44  ;;  %1365 = vst.msk [vmem:[#allocation2 + $0xe8] sm:$0xff] %vm272_vm3, %v1300_v42 }
 0x197   : > { %v1191_v7 = vpop.f32.mrf.mxu1  ;;  %v1594_v49 = vmax.f32 %v1530_v43, 0.0  ;;  %v1094_v53 = vpop.f32.mrf.mxu2 }
 0x198   : > { %v1192_v45 = vadd.f32 %v1191_v7, %v2587_v10  ;;  %v1563_v51 = vmax.f32 %v1499_v9, 0.0  ;;  %v1264_v56 = vadd.f32 %v1263_v25, %v1094_v53 }
 0x199   : > { %v1658_v55 = vpack.c.bf16 %v1594_v49, %v1594_v49  ;;  %v1017_v60 = vpop.f32.mrf.mxu0 }
 0x19a   : > { %v1303_v34 = vadd.f32 %v1192_v45, %v369_v47  ;;  %v1627_v33 = vpack.c.bf16 %v1563_v51, %v1563_v51  ;;  %v1187_v16 = vadd.f32 %v1186_v11, %v1017_v60  ;;  %v1332_v38 = vadd.f32 %v1264_v56, %v398_v52  ;;  %v399_v11 = vld [vmem:[#allocation2 + $0x1f0] sm:$0xff] }
 0x19b   : > { %1723 = vst.msk [vmem:[%s2627_s22 + $0xec] sm:$0xf] %vm1663_vm4, %v1658_v55 }
 0x19c   : > { %1692 = vst.msk [vmem:[%s2627_s22 + $0x70] sm:$0xf] %vm1663_vm4, %v1627_v33  ;;  %v1463_v61 = vld [vmem:[#allocation2 + $0x1e0] sm:$0xff]  ;;  %v1301_v62 = vadd.f32 %v1187_v16, %v367_v57 }
 0x19d   : > { %v1531_v1 = vadd.f32 %v2932_v48, %v1463_v61  ;;  %v1432_v10 = vld [vmem:[#allocation2 + $0xe8] sm:$0xff]  ;;  %1368 = vst.msk [vmem:[#allocation2 + $0x100] sm:$0xff] %vm272_vm3, %v1303_v34 }
 0x19e   : > { %v1500_v37 = vadd.f32 %v2932_v48, %v1432_v10  ;;  %1397 = vst.msk [vmem:[#allocation2 + $0x1e8] sm:$0xff] %vm272_vm3, %v1332_v38 }
 0x19f   : > { %v1193_v46 = vpop.f32.mrf.mxu1  ;;  %v1595_v63 = vmax.f32 %v1531_v1, 0.0  ;;  %1366 = vst.msk [vmem:[#allocation2 + $0xf0] sm:$0xff] %vm272_vm3, %v1301_v62  ;;  %v1097_v50 = vpop.f32.mrf.mxu2 }
 0x1a0   : > { %v1194_v58 = vadd.f32 %v1193_v46, %v2620_v27  ;;  %v1564_v6 = vmax.f32 %v1500_v37, 0.0  ;;  %v1267_v15 = vadd.f32 %v1266_v3, %v1097_v50 }
 0x1a1   : > { %v1659_v12 = vpack.c.bf16 %v1595_v63, %v1595_v63  ;;  %v1019_v17 = vpop.f32.mrf.mxu0 }
 0x1a2   : > { %v1304_v13 = vadd.f32 %v1194_v58, %v370_v4  ;;  %v1628_v18 = vpack.c.bf16 %v1564_v6, %v1564_v6  ;;  %v1189_v59 = vadd.f32 %v1188_v0, %v1019_v17  ;;  %v1333_v19 = vadd.f32 %v1267_v15, %v399_v11  ;;  %v1268_v0 = vpop.f32.mrf.mxu3 }
 0x1a3   : > { %1724 = vst.msk [vmem:[%s2627_s22 + $0xf0] sm:$0xf] %vm1663_vm4, %v1659_v12 }
 0x1a4   : > { %1693 = vst.msk [vmem:[%s2627_s22 + $0x74] sm:$0xf] %vm1663_vm4, %v1628_v18  ;;  %v1435_v20 = vld [vmem:[#allocation2 + $0x100] sm:$0xff]  ;;  %v1302_v54 = vadd.f32 %v1189_v59, %v368_v5 }
 0x1a5   : > { %v1503_v14 = vadd.f32 %v2932_v48, %v1435_v20  ;;  %v1464_v27 = vld [vmem:[#allocation2 + $0x1e8] sm:$0xff]  ;;  %1369 = vst.msk [vmem:[#allocation2 + $0x108] sm:$0xff] %vm272_vm3, %v1304_v13 }
 0x1a6   : > { %v1532_v21 = vadd.f32 %v2932_v48, %v1464_v27  ;;  %v1433_v39 = vld [vmem:[#allocation2 + $0xf0] sm:$0xff]  ;;  %1398 = vst.msk [vmem:[#allocation2 + $0x1f0] sm:$0xff] %vm272_vm3, %v1333_v19 }
 0x1a7   : > { %v1567_v23 = vmax.f32 %v1503_v14, 0.0  ;;  %v1501_v24 = vadd.f32 %v2932_v48, %v1433_v39  ;;  %1367 = vst.msk [vmem:[#allocation2 + $0xf8] sm:$0xff] %vm272_vm3, %v1302_v54  ;;  %v1099_v31 = vpop.f32.mrf.mxu2 }
 0x1a8   : > { %v1596_v28 = vmax.f32 %v1532_v21, 0.0  ;;  %v1269_v8 = vadd.f32 %v1268_v0, %v1099_v31 }
 0x1a9   : > { %v1631_v32 = vpack.c.bf16 %v1567_v23, %v1567_v23  ;;  %v1565_v26 = vmax.f32 %v1501_v24, 0.0 }
 0x1aa   : > { %v1660_v35 = vpack.c.bf16 %v1596_v28, %v1596_v28  ;;  %v1334_v2 = vadd.f32 %v1269_v8, %v400_v30 }
 0x1ab   : > { %1696 = vst.msk [vmem:[%s2627_s22 + $0x80] sm:$0xf] %vm1663_vm4, %v1631_v32  ;;  %v1629_v36 = vpack.c.bf16 %v1565_v26, %v1565_v26 }
 0x1ac   : > { %1725 = vst.msk [vmem:[%s2627_s22 + $0xf4] sm:$0xf] %vm1663_vm4, %v1660_v35  ;;  %v1436_v29 = vld [vmem:[#allocation2 + $0x108] sm:$0xff] }
 0x1ad   : > { %1694 = vst.msk [vmem:[%s2627_s22 + $0x78] sm:$0xf] %vm1663_vm4, %v1629_v36  ;;  %v1504_v40 = vadd.f32 %v2932_v48, %v1436_v29  ;;  %v1465_v22 = vld [vmem:[#allocation2 + $0x1f0] sm:$0xff] }
 0x1ae   : > { %v1533_v41 = vadd.f32 %v2932_v48, %v1465_v22  ;;  %v1434_v25 = vld [vmem:[#allocation2 + $0xf8] sm:$0xff]  ;;  %1399 = vst.msk [vmem:[#allocation2 + $0x1f8] sm:$0xff] %vm272_vm3, %v1334_v2 }
 0x1af   : > { %v1568_v42 = vmax.f32 %v1504_v40, 0.0  ;;  %v1502_v43 = vadd.f32 %v2932_v48, %v1434_v25 }
 0x1b0   : > { %v1597_v44 = vmax.f32 %v1533_v41, 0.0 }
 0x1b1   : > { %v1632_v9 = vpack.c.bf16 %v1568_v42, %v1568_v42  ;;  %v1566_v47 = vmax.f32 %v1502_v43, 0.0 }
 0x1b2   : > { %v1661_v7 = vpack.c.bf16 %v1597_v44, %v1597_v44 }
 0x1b3   : > { %1697 = vst.msk [vmem:[%s2627_s22 + $0x84] sm:$0xf] %vm1663_vm4, %v1632_v9  ;;  %v1630_v49 = vpack.c.bf16 %v1566_v47, %v1566_v47 }
 0x1b4   : > { %1726 = vst.msk [vmem:[%s2627_s22 + $0xf8] sm:$0xf] %vm1663_vm4, %v1661_v7 }
 0x1b5   : > { %1695 = vst.msk [vmem:[%s2627_s22 + $0x7c] sm:$0xf] %vm1663_vm4, %v1630_v49  ;;  %v1466_v45 = vld [vmem:[#allocation2 + $0x1f8] sm:$0xff] }
 0x1b6   : > { %v1534_v51 = vadd.f32 %v2932_v48, %v1466_v45 }
 0x1b8   : > { %v1598_v52 = vmax.f32 %v1534_v51, 0.0 }
 0x1ba   : > { %v1662_v53 = vpack.c.bf16 %v1598_v52, %v1598_v52 }
 0x1bc   : > { %1727 = vst.msk [vmem:[%s2627_s22 + $0xfc] sm:$0xf] %vm1663_vm4, %v1662_v53 }
 0x1bd PF: > { %s13_s14 = sadd.s32 1, %s2314_s14   ;;  %s3072_s12 = smov %s2310_s13 }
 0x1be   : > { %p10_p5 = scmp.ge.s32.totalorder %s13_s14, 6   ;;  %s3073_s13 = smov %s3075_s15 }
 0x1c0   :  { %12 = sbr.rel (!%p10_p5) target bundleno = 2 (0x2), region = 76 }

</bundles_post_ra>
